<compile_context>
chip_gen: v6e
topology: v6e:2x2x1
jax: 0.10.0
libtpu: 0.0.40
codegen_flags: <defaults>
</compile_context>

<pallas_src>
import functools

import jax
import jax.numpy as jnp
from jax.experimental import pallas as pl
from jax.experimental.pallas import tpu as pltpu


# ----------------------------------------------------------------------------
# Pallas kernel 1: nonbonded (van der Waals + electrostatics).
# Grid: (row blocks [parallel], col blocks [arbitrary/reduction]).
# Per-atom params packed as columns (sqrt(eps), rmin_half, sqrt(322)*q), so
# the pair parameters are pure VPU multiplies/adds in-kernel.
# ----------------------------------------------------------------------------
def _nonbonded_kernel(x_ref, xt_ref, prow_ref, pcol_ref, vdw_ref, ele_ref):
    i = pl.program_id(0)          # row block
    j = pl.program_id(1)          # col block (reduction axis)
    ti = x_ref.shape[0]
    nk = xt_ref.shape[1]

    # init the per-row-block accumulators (output block is resident across j)
    @pl.when(j == 0)
    def _():
        vdw_ref[...] = jnp.zeros_like(vdw_ref)
        ele_ref[...] = jnp.zeros_like(ele_ref)

    # triangular block scheduling: a block has kept (col > row) pairs only if
    # its max column index exceeds its min row index; otherwise skip all work.
    @pl.when((j + 1) * nk > i * ti)
    def _():
        # squared pairwise distances, one coordinate at a time (2D (ti, nk) tiles)
        d2 = jnp.zeros((ti, nk), jnp.float32)
        for d in range(3):
            diff = x_ref[:, d:d + 1] - xt_ref[d:d + 1, :]   # (ti,1)-(1,nk)->(ti,nk)
            d2 = d2 + diff * diff

        row = i * ti + jax.lax.broadcasted_iota(jnp.int32, (ti, nk), 0)
        col = j * nk + jax.lax.broadcasted_iota(jnp.int32, (ti, nk), 1)
        mask = col > row                                    # strict upper triangle

        # One rsqrt instead of sqrt + two divides.  Guard every masked-out
        # entry (diagonal and lower triangle) so rsqrt never sees 0.
        inv_dist = jax.lax.rsqrt(d2 + jnp.where(mask, 0.0, 1.0))

        # per-atom params -> pair params via combination rules (pure VPU)
        se_i, rh_i, cq_i = prow_ref[:, 0:1], prow_ref[:, 1:2], prow_ref[:, 2:3]
        se_j, rh_j, cq_j = pcol_ref[0:1, :], pcol_ref[1:2, :], pcol_ref[2:3, :]

        eps_ij = se_i * se_j                    # sqrt(eps_i)*sqrt(eps_j) = sqrt(eps_i*eps_j)
        rod = (rh_i + rh_j) * inv_dist          # rmin_ij / dist
        rod2 = rod * rod
        rod6 = rod2 * rod2 * rod2
        vdw = eps_ij * (rod6 * rod6 - 2.0 * rod6)
        ele = (cq_i * cq_j) * inv_dist          # 322 * q_i * q_j / dist

        # fold the (ti, nk) tile onto the resident (8, nk) accumulator slab:
        # layout-preserving reshape + outer-axis sum (plain vreg adds).
        vdw_f = jnp.sum(jnp.where(mask, vdw, 0.0).reshape(ti // 8, 8, nk), axis=0)
        ele_f = jnp.sum(jnp.where(mask, ele, 0.0).reshape(ti // 8, 8, nk), axis=0)
        vdw_ref[...] += vdw_f[None, :, :]
        ele_ref[...] += ele_f[None, :, :]


def nonbonded_energy(x, eps, rmin_half, q, *, ti=256, nk=512):
    """Sum over all unordered pairs of LJ + Coulomb energy (no exclusions)."""
    n = x.shape[0]
    ti = min(ti, n)
    nk = min(nk, n)
    assert n % ti == 0 and n % nk == 0 and ti % 8 == 0 and nk % 128 == 0
    n_i, n_j = n // ti, n // nk

    xt = x.T.astype(jnp.float32)                                        # (3, N)
    # packed per-atom params: (sqrt(eps), rmin_half, sqrt(322)*q)
    prow = jnp.stack([jnp.sqrt(eps), rmin_half, jnp.sqrt(322.0) * q],
                     axis=1).astype(jnp.float32)                        # (N, 3)
    pcol = prow.T                                                       # (3, N)

    vdw_p, ele_p = pl.pallas_call(
        _nonbonded_kernel,
        out_shape=(jax.ShapeDtypeStruct((n_i, 8, nk), jnp.float32),
                   jax.ShapeDtypeStruct((n_i, 8, nk), jnp.float32)),
        grid=(n_i, n_j),
        in_specs=[
            pl.BlockSpec((ti, 3), lambda i, j: (i, 0)),     # x rows
            pl.BlockSpec((3, nk), lambda i, j: (0, j)),     # x^T cols
            pl.BlockSpec((ti, 3), lambda i, j: (i, 0)),     # per-atom params (rows)
            pl.BlockSpec((3, nk), lambda i, j: (0, j)),     # per-atom params (cols)
        ],
        out_specs=(pl.BlockSpec((1, 8, nk), lambda i, j: (i, 0, 0)),
                   pl.BlockSpec((1, 8, nk), lambda i, j: (i, 0, 0))),
        compiler_params=pltpu.CompilerParams(
            dimension_semantics=("parallel", "arbitrary")),
    )(x.astype(jnp.float32), xt, prow, pcol)

    # final (tiny) reductions of the lane-dense partials in plain JAX
    return jnp.sum(vdw_p), jnp.sum(ele_p)


def _excluded_nonbonded(x, excl, eps, rmin_half, q):
    """Plain-JAX energy of the excluded 1-2 / 1-3 pairs (subtracted outside)."""
    a, b = excl[:, 0], excl[:, 1]
    d = jnp.sqrt(jnp.sum((x[a] - x[b]) ** 2, axis=1))
    eps_ij = jnp.sqrt(eps[a] * eps[b])
    rod6 = ((rmin_half[a] + rmin_half[b]) / d) ** 6
    vdw = eps_ij * (rod6 * rod6 - 2.0 * rod6)
    ele = 322.0 * q[a] * q[b] / d
    return jnp.sum(vdw), jnp.sum(ele)


# ----------------------------------------------------------------------------
# Pallas kernel 2: harmonic distance energy  sum_m k_m * (|r_s - r_t| - r0_m)^2
# Lane-major layout: coordinates (3, M), k/r0 (1, M)  (M on the 128-lane axis).
# ----------------------------------------------------------------------------
def _harmonic_kernel(vs_ref, vt_ref, k_ref, r0_ref, out_ref):
    dx = vs_ref[0:1, :] - vt_ref[0:1, :]
    dy = vs_ref[1:2, :] - vt_ref[1:2, :]
    dz = vs_ref[2:3, :] - vt_ref[2:3, :]
    dis = jnp.sqrt(dx * dx + dy * dy + dz * dz)          # (1, M)
    e = k_ref[...] * (dis - r0_ref[...]) ** 2            # (1, M)
    out_ref[...] = jnp.sum(e, keepdims=True)             # (1, 1)


def harmonic_energy(vs, vt, k, r0):
    m = vs.shape[0]
    out = pl.pallas_call(
        _harmonic_kernel,
        out_shape=jax.ShapeDtypeStruct((1, 1), jnp.float32),
        grid=(1,),
        in_specs=[
            pl.BlockSpec((3, m), lambda i: (0, 0)),
            pl.BlockSpec((3, m), lambda i: (0, 0)),
            pl.BlockSpec((1, m), lambda i: (0, 0)),
            pl.BlockSpec((1, m), lambda i: (0, 0)),
        ],
        out_specs=pl.BlockSpec((1, 1), lambda i: (0, 0)),
    )(vs.T.astype(jnp.float32), vt.T.astype(jnp.float32),
      k.reshape(1, m).astype(jnp.float32), r0.reshape(1, m).astype(jnp.float32))
    return out[0, 0]


# ----------------------------------------------------------------------------
# Plain-JAX glue for angle / dihedral / improper terms (gather + arccos heavy).
# ----------------------------------------------------------------------------
def _angle_energy(x, angle, kt, t0_deg):
    t0 = jnp.deg2rad(t0_deg)
    ba = x[angle[:, 0]] - x[angle[:, 1]]
    bc = x[angle[:, 2]] - x[angle[:, 1]]
    cos_t = jnp.sum(ba * bc, axis=1) / (
        jnp.linalg.norm(ba, axis=1) * jnp.linalg.norm(bc, axis=1))
    cos_t = jnp.clip(cos_t, -0.9999, 0.9999)
    theta = jnp.arccos(cos_t)
    return jnp.sum(kt * (theta - t0) ** 2)


def _torsion_angle(x, quad):
    ab = x[quad[:, 1]] - x[quad[:, 0]]
    bc = x[quad[:, 2]] - x[quad[:, 1]]
    cd = x[quad[:, 3]] - x[quad[:, 2]]
    n1 = jnp.cross(ab, bc)
    n2 = jnp.cross(bc, cd)
    cosv = jnp.sum(n1 * n2, axis=1) / (
        jnp.linalg.norm(n1, axis=1) * jnp.linalg.norm(n2, axis=1))
    cosv = jnp.clip(cosv, -0.9999, 0.9999)
    ang = jnp.arccos(cosv)
    ang = ang * jnp.sign(jnp.sum(jnp.cross(n1, n2) * bc, axis=1))
    return ang


# ----------------------------------------------------------------------------
# Full forward pass (matches ForceField.forward semantics)
# ----------------------------------------------------------------------------
@functools.partial(jax.jit, static_argnames=("nb_ti", "nb_nk"))
def force_field(x, prm, nb_ti=256, nb_nk=512):
    # bond
    bond = prm["bond"]
    V_bond = harmonic_energy(x[bond[:, 0]], x[bond[:, 1]], prm["kb"], prm["b0"])

    # angle
    V_angle = _angle_energy(x, prm["angle"], prm["kt"], prm["t0"])

    # Urey-Bradley
    ub = prm["ureybradley"]
    V_ub = harmonic_energy(x[ub[:, 0]], x[ub[:, 1]], prm["ku"], prm["s0"])

    # dihedral
    delta = _torsion_angle(x, prm["dihedral"])
    d0 = jnp.deg2rad(prm["d0"])
    V_dihedral = jnp.sum(prm["kd"] * (1.0 + jnp.cos(prm["nd"] * delta - d0)))

    # improper
    psi = _torsion_angle(x, prm["improper"])
    p0 = jnp.deg2rad(prm["p0"])
    V_improper = jnp.sum(prm["kp"] * (psi - p0) ** 2)

    # nonbonded (Pallas, tiled, all pairs) minus excluded 1-2 / 1-3 pairs
    V_vdw_all, V_ele_all = nonbonded_energy(
        x, prm["eps"], prm["rmin_half"], prm["q"], ti=nb_ti, nk=nb_nk)
    excl_vdw, excl_ele = _excluded_nonbonded(
        x, prm["excl"], prm["eps"], prm["rmin_half"], prm["q"])
    V_vdw = V_vdw_all - excl_vdw
    V_ele = V_ele_all - excl_ele

    return V_bond + V_angle + V_ub + V_dihedral + V_improper + V_vdw + V_ele


# ----------------------------------------------------------------------------
# Pure-JAX reference (dense (N,N) matrices, mirrors the original torch math).
# ----------------------------------------------------------------------------
def _harmonic_ref(vs, vt, k, r0):
    dis = jnp.sqrt(jnp.sum((vs - vt) ** 2, axis=1))
    return jnp.sum(k * (dis - r0) ** 2)


@jax.jit
def force_field_ref(x, prm):
    bond, ub = prm["bond"], prm["ureybradley"]
    V_bond = _harmonic_ref(x[bond[:, 0]], x[bond[:, 1]], prm["kb"], prm["b0"])
    V_angle = _angle_energy(x, prm["angle"], prm["kt"], prm["t0"])
    V_ub = _harmonic_ref(x[ub[:, 0]], x[ub[:, 1]], prm["ku"], prm["s0"])
    delta = _torsion_angle(x, prm["dihedral"])
    V_dihedral = jnp.sum(prm["kd"] * (1.0 + jnp.cos(prm["nd"] * delta - jnp.deg2rad(prm["d0"]))))
    psi = _torsion_angle(x, prm["improper"])
    V_improper = jnp.sum(prm["kp"] * (psi - jnp.deg2rad(prm["p0"])) ** 2)

    n = x.shape[0]
    eps, rmh, q, excl = prm["eps"], prm["rmin_half"], prm["q"], prm["excl"]
    eps_ij = jnp.sqrt(eps[:, None] * eps[None, :])
    rmin_ij = rmh[:, None] + rmh[None, :]
    kqq_ij = 322.0 * q[:, None] * q[None, :]
    a, b = excl[:, 0], excl[:, 1]
    eps_ij = eps_ij.at[a, b].set(0.0).at[b, a].set(0.0)
    kqq_ij = kqq_ij.at[a, b].set(0.0).at[b, a].set(0.0)
    diff = x[:, None, :] - x[None, :, :]
    dist = jnp.sqrt(jnp.sum(diff * diff, axis=-1)) + jnp.eye(n, dtype=x.dtype)
    rod6 = (rmin_ij / dist) ** 6
    vdw = eps_ij * (rod6 * rod6 - 2.0 * rod6)
    ele = kqq_ij / dist
    triu = jnp.triu(jnp.ones((n, n), bool), k=1)
    V_vdw = jnp.sum(jnp.where(triu, vdw, 0.0))
    V_ele = jnp.sum(jnp.where(triu, ele, 0.0))
    return V_bond + V_angle + V_ub + V_dihedral + V_improper + V_vdw + V_ele


# ----------------------------------------------------------------------------
# Deterministic synthetic topology / parameters (stand-in for .initialize()).
# ----------------------------------------------------------------------------
def make_params(key, n):
    ks = jax.random.split(key, 16)
    idx = jnp.arange(n)

    # synthetic chain topology
    bond = jnp.stack([idx[:-1], idx[1:]], axis=1).astype(jnp.int32)          # (n-1, 2)
    angle = jnp.stack([idx[:-2], idx[1:-1], idx[2:]], axis=1).astype(jnp.int32)
    ub = jnp.stack([idx[:-2], idx[2:]], axis=1).astype(jnp.int32)
    dihedral = jnp.stack([idx[:-3], idx[1:-2], idx[2:-1], idx[3:]], axis=1).astype(jnp.int32)
    improper = dihedral[::4]

    u = lambda k, shape, lo, hi: jax.random.uniform(k, shape, jnp.float32, lo, hi)

    kb = u(ks[1], (bond.shape[0],), 100.0, 400.0)
    b0 = u(ks[2], (bond.shape[0],), 1.0, 1.6)
    kt = u(ks[3], (angle.shape[0],), 40.0, 80.0)
    t0 = u(ks[4], (angle.shape[0],), 100.0, 120.0)        # degrees
    ku = u(ks[5], (ub.shape[0],), 10.0, 40.0)
    s0 = u(ks[6], (ub.shape[0],), 2.0, 3.0)
    kd = u(ks[7], (dihedral.shape[0],), 0.1, 2.0)
    nd = jax.random.randint(ks[8], (dihedral.shape[0],), 1, 4).astype(jnp.float32)
    d0 = u(ks[9], (dihedral.shape[0],), 0.0, 180.0)       # degrees
    kp = u(ks[10], (improper.shape[0],), 20.0, 80.0)
    p0 = u(ks[11], (improper.shape[0],), 0.0, 10.0)       # degrees

    # per-atom nonbonded parameters (no NxN matrices any more)
    eps = u(ks[12], (n,), 0.05, 0.2)
    rmin_half = u(ks[13], (n,), 1.5, 2.2)
    q = u(ks[14], (n,), -0.5, 0.5)

    # 1-2 (bonded) and 1-3 (angle-endpoint) exclusions; for this chain topology
    # every unordered pair appears exactly once in the list.
    excl = jnp.concatenate([bond, angle[:, jnp.array([0, 2])]], axis=0).astype(jnp.int32)

    return dict(bond=bond, kb=kb, b0=b0,
                angle=angle, kt=kt, t0=t0,
                ureybradley=ub, ku=ku, s0=s0,
                dihedral=dihedral, kd=kd, nd=nd, d0=d0,
                improper=improper, kp=kp, p0=p0,
                eps=eps, rmin_half=rmin_half, q=q, excl=excl)


if __name__ == "__main__":
    key = jax.random.PRNGKey(0)
    kx, kp = jax.random.split(key)

    N = 512  # number of atoms

    # well-separated synthetic coordinates: perturbed 8x8x8 lattice, spacing 2.0
    idx = jnp.arange(N)
    base = jnp.stack([idx % 8, (idx // 8) % 8, idx // 64], axis=1).astype(jnp.float32) * 2.0
    x = base + 0.3 * jax.random.normal(kx, (N, 3), jnp.float32)

    prm = make_params(kp, N)

    # small tiles for the demo so the (row, col) grid, triangular skip and the
    # column-axis accumulation are all exercised (grid = 4 x 4 here);
    # production defaults are ti=256, nk=512 (re-derive per generation / VMEM).
    V = force_field(x, prm, nb_ti=128, nb_nk=128)
    V = jax.block_until_ready(V)
    assert jnp.isfinite(V), "non-finite potential"

    V_ref = force_field_ref(x, prm)
    assert jnp.allclose(V, V_ref, rtol=5e-3), (float(V), float(V_ref))

    print("KERNEL_OK")
</pallas_src>

<mosaic_0001>
module attributes {stable_mosaic.version = 11 : i64} {
  func.func @_harmonic_kernel(%arg0: i32, %arg1: memref<3x511xf32, #tpu.memory_space<vmem>>, %arg2: memref<3x511xf32, #tpu.memory_space<vmem>>, %arg3: memref<1x511xf32, #tpu.memory_space<vmem>>, %arg4: memref<1x511xf32, #tpu.memory_space<vmem>>, %arg5: memref<1x1xf32, #tpu.memory_space<vmem>>) attributes {dimension_semantics = [#tpu.dimension_semantics<arbitrary>], iteration_bounds = array<i64: 1>, scalar_prefetch = 0 : i64, scratch_operands = 0 : i64, tpu.core_type = #tpu.core_type<tc>, window_params = [{pipeline_mode = #tpu.pipeline_mode<synchronous>, transform_indices = @transform_0, window_bounds = array<i64: 3, 511>}, {pipeline_mode = #tpu.pipeline_mode<synchronous>, transform_indices = @transform_1, window_bounds = array<i64: 3, 511>}, {pipeline_mode = #tpu.pipeline_mode<synchronous>, transform_indices = @transform_2, window_bounds = array<i64: 1, 511>}, {pipeline_mode = #tpu.pipeline_mode<synchronous>, transform_indices = @transform_3, window_bounds = array<i64: 1, 511>}, {pipeline_mode = #tpu.pipeline_mode<synchronous>, transform_indices = @transform_4, window_bounds = array<i64: 1, 1>}]} {
    %c0 = arith.constant 0 : index
    %c0_0 = arith.constant 0 : index
    %0 = vector.load %arg1[%c0, %c0_0] : memref<3x511xf32, #tpu.memory_space<vmem>>, vector<1x511xf32>
    %c0_1 = arith.constant 0 : index
    %c0_2 = arith.constant 0 : index
    %1 = vector.load %arg2[%c0_1, %c0_2] : memref<3x511xf32, #tpu.memory_space<vmem>>, vector<1x511xf32>
    %2 = arith.subf %0, %1 : vector<1x511xf32>
    %c1 = arith.constant 1 : index
    %c0_3 = arith.constant 0 : index
    %3 = vector.load %arg1[%c1, %c0_3] : memref<3x511xf32, #tpu.memory_space<vmem>>, vector<1x511xf32>
    %c1_4 = arith.constant 1 : index
    %c0_5 = arith.constant 0 : index
    %4 = vector.load %arg2[%c1_4, %c0_5] : memref<3x511xf32, #tpu.memory_space<vmem>>, vector<1x511xf32>
    %5 = arith.subf %3, %4 : vector<1x511xf32>
    %c2 = arith.constant 2 : index
    %c0_6 = arith.constant 0 : index
    %6 = vector.load %arg1[%c2, %c0_6] : memref<3x511xf32, #tpu.memory_space<vmem>>, vector<1x511xf32>
    %c2_7 = arith.constant 2 : index
    %c0_8 = arith.constant 0 : index
    %7 = vector.load %arg2[%c2_7, %c0_8] : memref<3x511xf32, #tpu.memory_space<vmem>>, vector<1x511xf32>
    %8 = arith.subf %6, %7 : vector<1x511xf32>
    %9 = arith.mulf %2, %2 : vector<1x511xf32>
    %10 = arith.mulf %5, %5 : vector<1x511xf32>
    %11 = arith.addf %9, %10 : vector<1x511xf32>
    %12 = arith.mulf %8, %8 : vector<1x511xf32>
    %13 = arith.addf %11, %12 : vector<1x511xf32>
    %14 = math.sqrt %13 : vector<1x511xf32>
    %c0_9 = arith.constant 0 : index
    %c0_10 = arith.constant 0 : index
    %15 = vector.load %arg3[%c0_9, %c0_10] : memref<1x511xf32, #tpu.memory_space<vmem>>, vector<1x511xf32>
    %c0_11 = arith.constant 0 : index
    %c0_12 = arith.constant 0 : index
    %16 = vector.load %arg4[%c0_11, %c0_12] : memref<1x511xf32, #tpu.memory_space<vmem>>, vector<1x511xf32>
    %17 = arith.subf %14, %16 : vector<1x511xf32>
    %18 = arith.mulf %17, %17 : vector<1x511xf32>
    %19 = arith.mulf %15, %18 : vector<1x511xf32>
    %20 = vector.shape_cast %19 : vector<1x511xf32> to vector<1x1x511xf32>
    %cst = arith.constant dense<0.000000e+00> : vector<1xf32>
    %21 = vector.multi_reduction <add>, %20, %cst [1, 2] : vector<1x1x511xf32> to vector<1xf32>
    %22 = vector.shape_cast %21 : vector<1xf32> to vector<1x1x1xf32>
    %23 = vector.extract %22[0, 0, 0] : f32 from vector<1x1x1xf32>
    %24 = vector.broadcast %23 : f32 to vector<1x1xf32>
    %c0_13 = arith.constant 0 : index
    %c0_14 = arith.constant 0 : index
    %25 = vector.load %arg5[%c0_13, %c0_14] : memref<1x1xf32, #tpu.memory_space<vmem>>, vector<1x1xf32>
    tpu.vector_store %arg5[%c0_13, %c0_14], %24 {strides = array<i32>} : memref<1x1xf32, #tpu.memory_space<vmem>>, vector<1x1xf32>,
    return
  }
  func.func @transform_0(%arg0: i32) -> (i32, i32) {
    %c0_i32 = arith.constant 0 : i32
    %c0_i32_0 = arith.constant 0 : i32
    %c0_i32_1 = arith.constant 0 : i32
    return %c0_i32, %c0_i32_0 : i32, i32
  }
  func.func @transform_1(%arg0: i32) -> (i32, i32) {
    %c0_i32 = arith.constant 0 : i32
    %c0_i32_0 = arith.constant 0 : i32
    %c0_i32_1 = arith.constant 0 : i32
    return %c0_i32, %c0_i32_0 : i32, i32
  }
  func.func @transform_2(%arg0: i32) -> (i32, i32) {
    %c0_i32 = arith.constant 0 : i32
    %c0_i32_0 = arith.constant 0 : i32
    %c0_i32_1 = arith.constant 0 : i32
    return %c0_i32, %c0_i32_0 : i32, i32
  }
  func.func @transform_3(%arg0: i32) -> (i32, i32) {
    %c0_i32 = arith.constant 0 : i32
    %c0_i32_0 = arith.constant 0 : i32
    %c0_i32_1 = arith.constant 0 : i32
    return %c0_i32, %c0_i32_0 : i32, i32
  }
  func.func @transform_4(%arg0: i32) -> (i32, i32) {
    %c0_i32 = arith.constant 0 : i32
    %c0_i32_0 = arith.constant 0 : i32
    %c0_i32_1 = arith.constant 0 : i32
    return %c0_i32, %c0_i32_0 : i32, i32
  }
}

module attributes {stable_mosaic.version = 11 : i64} {
  func.func @_harmonic_kernel(%arg0: i32, %arg1: memref<3x510xf32, #tpu.memory_space<vmem>>, %arg2: memref<3x510xf32, #tpu.memory_space<vmem>>, %arg3: memref<1x510xf32, #tpu.memory_space<vmem>>, %arg4: memref<1x510xf32, #tpu.memory_space<vmem>>, %arg5: memref<1x1xf32, #tpu.memory_space<vmem>>) attributes {dimension_semantics = [#tpu.dimension_semantics<arbitrary>], iteration_bounds = array<i64: 1>, scalar_prefetch = 0 : i64, scratch_operands = 0 : i64, tpu.core_type = #tpu.core_type<tc>, window_params = [{pipeline_mode = #tpu.pipeline_mode<synchronous>, transform_indices = @transform_0, window_bounds = array<i64: 3, 510>}, {pipeline_mode = #tpu.pipeline_mode<synchronous>, transform_indices = @transform_1, window_bounds = array<i64: 3, 510>}, {pipeline_mode = #tpu.pipeline_mode<synchronous>, transform_indices = @transform_2, window_bounds = array<i64: 1, 510>}, {pipeline_mode = #tpu.pipeline_mode<synchronous>, transform_indices = @transform_3, window_bounds = array<i64: 1, 510>}, {pipeline_mode = #tpu.pipeline_mode<synchronous>, transform_indices = @transform_4, window_bounds = array<i64: 1, 1>}]} {
    %c0 = arith.constant 0 : index
    %c0_0 = arith.constant 0 : index
    %0 = vector.load %arg1[%c0, %c0_0] : memref<3x510xf32, #tpu.memory_space<vmem>>, vector<1x510xf32>
    %c0_1 = arith.constant 0 : index
    %c0_2 = arith.constant 0 : index
    %1 = vector.load %arg2[%c0_1, %c0_2] : memref<3x510xf32, #tpu.memory_space<vmem>>, vector<1x510xf32>
    %2 = arith.subf %0, %1 : vector<1x510xf32>
    %c1 = arith.constant 1 : index
    %c0_3 = arith.constant 0 : index
    %3 = vector.load %arg1[%c1, %c0_3] : memref<3x510xf32, #tpu.memory_space<vmem>>, vector<1x510xf32>
    %c1_4 = arith.constant 1 : index
    %c0_5 = arith.constant 0 : index
    %4 = vector.load %arg2[%c1_4, %c0_5] : memref<3x510xf32, #tpu.memory_space<vmem>>, vector<1x510xf32>
    %5 = arith.subf %3, %4 : vector<1x510xf32>
    %c2 = arith.constant 2 : index
    %c0_6 = arith.constant 0 : index
    %6 = vector.load %arg1[%c2, %c0_6] : memref<3x510xf32, #tpu.memory_space<vmem>>, vector<1x510xf32>
    %c2_7 = arith.constant 2 : index
    %c0_8 = arith.constant 0 : index
    %7 = vector.load %arg2[%c2_7, %c0_8] : memref<3x510xf32, #tpu.memory_space<vmem>>, vector<1x510xf32>
    %8 = arith.subf %6, %7 : vector<1x510xf32>
    %9 = arith.mulf %2, %2 : vector<1x510xf32>
    %10 = arith.mulf %5, %5 : vector<1x510xf32>
    %11 = arith.addf %9, %10 : vector<1x510xf32>
    %12 = arith.mulf %8, %8 : vector<1x510xf32>
    %13 = arith.addf %11, %12 : vector<1x510xf32>
    %14 = math.sqrt %13 : vector<1x510xf32>
    %c0_9 = arith.constant 0 : index
    %c0_10 = arith.constant 0 : index
    %15 = vector.load %arg3[%c0_9, %c0_10] : memref<1x510xf32, #tpu.memory_space<vmem>>, vector<1x510xf32>
    %c0_11 = arith.constant 0 : index
    %c0_12 = arith.constant 0 : index
    %16 = vector.load %arg4[%c0_11, %c0_12] : memref<1x510xf32, #tpu.memory_space<vmem>>, vector<1x510xf32>
    %17 = arith.subf %14, %16 : vector<1x510xf32>
    %18 = arith.mulf %17, %17 : vector<1x510xf32>
    %19 = arith.mulf %15, %18 : vector<1x510xf32>
    %20 = vector.shape_cast %19 : vector<1x510xf32> to vector<1x1x510xf32>
    %cst = arith.constant dense<0.000000e+00> : vector<1xf32>
    %21 = vector.multi_reduction <add>, %20, %cst [1, 2] : vector<1x1x510xf32> to vector<1xf32>
    %22 = vector.shape_cast %21 : vector<1xf32> to vector<1x1x1xf32>
    %23 = vector.extract %22[0, 0, 0] : f32 from vector<1x1x1xf32>
    %24 = vector.broadcast %23 : f32 to vector<1x1xf32>
    %c0_13 = arith.constant 0 : index
    %c0_14 = arith.constant 0 : index
    %25 = vector.load %arg5[%c0_13, %c0_14] : memref<1x1xf32, #tpu.memory_space<vmem>>, vector<1x1xf32>
    tpu.vector_store %arg5[%c0_13, %c0_14], %24 {strides = array<i32>} : memref<1x1xf32, #tpu.memory_space<vmem>>, vector<1x1xf32>,
    return
  }
  func.func @transform_0(%arg0: i32) -> (i32, i32) {
    %c0_i32 = arith.constant 0 : i32
    %c0_i32_0 = arith.constant 0 : i32
    %c0_i32_1 = arith.constant 0 : i32
    return %c0_i32, %c0_i32_0 : i32, i32
  }
  func.func @transform_1(%arg0: i32) -> (i32, i32) {
    %c0_i32 = arith.constant 0 : i32
    %c0_i32_0 = arith.constant 0 : i32
    %c0_i32_1 = arith.constant 0 : i32
    return %c0_i32, %c0_i32_0 : i32, i32
  }
  func.func @transform_2(%arg0: i32) -> (i32, i32) {
    %c0_i32 = arith.constant 0 : i32
    %c0_i32_0 = arith.constant 0 : i32
    %c0_i32_1 = arith.constant 0 : i32
    return %c0_i32, %c0_i32_0 : i32, i32
  }
  func.func @transform_3(%arg0: i32) -> (i32, i32) {
    %c0_i32 = arith.constant 0 : i32
    %c0_i32_0 = arith.constant 0 : i32
    %c0_i32_1 = arith.constant 0 : i32
    return %c0_i32, %c0_i32_0 : i32, i32
  }
  func.func @transform_4(%arg0: i32) -> (i32, i32) {
    %c0_i32 = arith.constant 0 : i32
    %c0_i32_0 = arith.constant 0 : i32
    %c0_i32_1 = arith.constant 0 : i32
    return %c0_i32, %c0_i32_0 : i32, i32
  }
}

module attributes {stable_mosaic.version = 11 : i64} {
  func.func @_nonbonded_kernel(%arg0: i32, %arg1: i32, %arg2: memref<128x3xf32, #tpu.memory_space<vmem>>, %arg3: memref<3x128xf32, #tpu.memory_space<vmem>>, %arg4: memref<128x3xf32, #tpu.memory_space<vmem>>, %arg5: memref<3x128xf32, #tpu.memory_space<vmem>>, %arg6: memref<1x8x128xf32, #tpu.memory_space<vmem>>, %arg7: memref<1x8x128xf32, #tpu.memory_space<vmem>>) attributes {dimension_semantics = [#tpu.dimension_semantics<parallel>, #tpu.dimension_semantics<arbitrary>], iteration_bounds = array<i64: 4, 4>, scalar_prefetch = 0 : i64, scratch_operands = 0 : i64, tpu.core_type = #tpu.core_type<tc>, window_params = [{transform_indices = @transform_0, window_bounds = array<i64: 128, 3>}, {transform_indices = @transform_1, window_bounds = array<i64: 3, 128>}, {transform_indices = @transform_2, window_bounds = array<i64: 128, 3>}, {transform_indices = @transform_3, window_bounds = array<i64: 3, 128>}, {transform_indices = @transform_4, window_bounds = array<i64: 1, 8, 128>}, {transform_indices = @transform_5, window_bounds = array<i64: 1, 8, 128>}]} {
    %c0_i32 = arith.constant 0 : i32
    %0 = arith.cmpi eq, %arg1, %c0_i32 : i32
    %1 = arith.extui %0 : i1 to i32
    %c0_i32_0 = arith.constant 0 : i32
    %2 = arith.cmpi ne, %1, %c0_i32_0 : i32
    scf.if %2 {
      %cst = arith.constant 0.000000e+00 : f32
      %9 = vector.broadcast %cst : f32 to vector<1x8x128xf32>
      %c0 = arith.constant 0 : index
      %c0_3 = arith.constant 0 : index
      %c0_4 = arith.constant 0 : index
      %10 = vector.load %arg6[%c0, %c0_3, %c0_4] : memref<1x8x128xf32, #tpu.memory_space<vmem>>, vector<1x8x128xf32>
      tpu.vector_store %arg6[%c0, %c0_3, %c0_4], %9 {strides = array<i32>} : memref<1x8x128xf32, #tpu.memory_space<vmem>>, vector<1x8x128xf32>,
      %cst_5 = arith.constant 0.000000e+00 : f32
      %11 = vector.broadcast %cst_5 : f32 to vector<1x8x128xf32>
      %c0_6 = arith.constant 0 : index
      %c0_7 = arith.constant 0 : index
      %c0_8 = arith.constant 0 : index
      %12 = vector.load %arg7[%c0_6, %c0_7, %c0_8] : memref<1x8x128xf32, #tpu.memory_space<vmem>>, vector<1x8x128xf32>
      tpu.vector_store %arg7[%c0_6, %c0_7, %c0_8], %11 {strides = array<i32>} : memref<1x8x128xf32, #tpu.memory_space<vmem>>, vector<1x8x128xf32>,
    } else {
    }
    %c1_i32 = arith.constant 1 : i32
    %3 = arith.addi %arg1, %c1_i32 : i32
    %c128_i32 = arith.constant 128 : i32
    %4 = arith.muli %3, %c128_i32 : i32
    %c128_i32_1 = arith.constant 128 : i32
    %5 = arith.muli %arg0, %c128_i32_1 : i32
    %6 = arith.cmpi sgt, %4, %5 : i32
    %7 = arith.extui %6 : i1 to i32
    %c0_i32_2 = arith.constant 0 : i32
    %8 = arith.cmpi ne, %7, %c0_i32_2 : i32
    scf.if %8 {
      %cst = arith.constant 0.000000e+00 : f32
      %9 = vector.broadcast %cst : f32 to vector<128x128xf32>
      %c0 = arith.constant 0 : index
      %c0_3 = arith.constant 0 : index
      %10 = vector.load %arg2[%c0, %c0_3] : memref<128x3xf32, #tpu.memory_space<vmem>>, vector<128x1xf32>
      %c0_4 = arith.constant 0 : index
      %c0_5 = arith.constant 0 : index
      %11 = vector.load %arg3[%c0_4, %c0_5] : memref<3x128xf32, #tpu.memory_space<vmem>>, vector<1x128xf32>
      %12 = vector.broadcast %10 : vector<128x1xf32> to vector<128x128xf32>
      %13 = vector.broadcast %11 : vector<1x128xf32> to vector<128x128xf32>
      %14 = arith.subf %12, %13 : vector<128x128xf32>
      %15 = arith.mulf %14, %14 : vector<128x128xf32>
      %16 = arith.addf %9, %15 : vector<128x128xf32>
      %c0_6 = arith.constant 0 : index
      %c1 = arith.constant 1 : index
      %17 = vector.load %arg2[%c0_6, %c1] : memref<128x3xf32, #tpu.memory_space<vmem>>, vector<128x1xf32>
      %c1_7 = arith.constant 1 : index
      %c0_8 = arith.constant 0 : index
      %18 = vector.load %arg3[%c1_7, %c0_8] : memref<3x128xf32, #tpu.memory_space<vmem>>, vector<1x128xf32>
      %19 = vector.broadcast %17 : vector<128x1xf32> to vector<128x128xf32>
      %20 = vector.broadcast %18 : vector<1x128xf32> to vector<128x128xf32>
      %21 = arith.subf %19, %20 : vector<128x128xf32>
      %22 = arith.mulf %21, %21 : vector<128x128xf32>
      %23 = arith.addf %16, %22 : vector<128x128xf32>
      %c0_9 = arith.constant 0 : index
      %c2 = arith.constant 2 : index
      %24 = vector.load %arg2[%c0_9, %c2] : memref<128x3xf32, #tpu.memory_space<vmem>>, vector<128x1xf32>
      %c2_10 = arith.constant 2 : index
      %c0_11 = arith.constant 0 : index
      %25 = vector.load %arg3[%c2_10, %c0_11] : memref<3x128xf32, #tpu.memory_space<vmem>>, vector<1x128xf32>
      %26 = vector.broadcast %24 : vector<128x1xf32> to vector<128x128xf32>
      %27 = vector.broadcast %25 : vector<1x128xf32> to vector<128x128xf32>
      %28 = arith.subf %26, %27 : vector<128x128xf32>
      %29 = arith.mulf %28, %28 : vector<128x128xf32>
      %30 = arith.addf %23, %29 : vector<128x128xf32>
      %c128_i32_12 = arith.constant 128 : i32
      %31 = arith.muli %arg0, %c128_i32_12 : i32
      %32 = tpu.iota {dimensions = array<i32: 0>} : vector<128x128xi32>
      %33 = vector.broadcast %31 : i32 to vector<128x128xi32>
      %34 = arith.addi %33, %32 : vector<128x128xi32>
      %c128_i32_13 = arith.constant 128 : i32
      %35 = arith.muli %arg1, %c128_i32_13 : i32
      %36 = tpu.iota {dimensions = array<i32: 1>} : vector<128x128xi32>
      %37 = vector.broadcast %35 : i32 to vector<128x128xi32>
      %38 = arith.addi %37, %36 : vector<128x128xi32>
      %39 = arith.cmpi sgt, %38, %34 : vector<128x128xi32>
      %cst_14 = arith.constant 0.000000e+00 : f32
      %cst_15 = arith.constant 1.000000e+00 : f32
      %40 = vector.broadcast %cst_14 : f32 to vector<128x128xf32>
      %41 = vector.broadcast %cst_15 : f32 to vector<128x128xf32>
      %42 = arith.select %39, %40, %41 : vector<128x128xi1>, vector<128x128xf32>
      %43 = arith.addf %30, %42 : vector<128x128xf32>
      %44 = math.rsqrt %43 : vector<128x128xf32>
      %c0_16 = arith.constant 0 : index
      %c0_17 = arith.constant 0 : index
      %45 = vector.load %arg4[%c0_16, %c0_17] : memref<128x3xf32, #tpu.memory_space<vmem>>, vector<128x1xf32>
      %c0_18 = arith.constant 0 : index
      %c1_19 = arith.constant 1 : index
      %46 = vector.load %arg4[%c0_18, %c1_19] : memref<128x3xf32, #tpu.memory_space<vmem>>, vector<128x1xf32>
      %c0_20 = arith.constant 0 : index
      %c2_21 = arith.constant 2 : index
      %47 = vector.load %arg4[%c0_20, %c2_21] : memref<128x3xf32, #tpu.memory_space<vmem>>, vector<128x1xf32>
      %c0_22 = arith.constant 0 : index
      %c0_23 = arith.constant 0 : index
      %48 = vector.load %arg5[%c0_22, %c0_23] : memref<3x128xf32, #tpu.memory_space<vmem>>, vector<1x128xf32>
      %c1_24 = arith.constant 1 : index
      %c0_25 = arith.constant 0 : index
      %49 = vector.load %arg5[%c1_24, %c0_25] : memref<3x128xf32, #tpu.memory_space<vmem>>, vector<1x128xf32>
      %c2_26 = arith.constant 2 : index
      %c0_27 = arith.constant 0 : index
      %50 = vector.load %arg5[%c2_26, %c0_27] : memref<3x128xf32, #tpu.memory_space<vmem>>, vector<1x128xf32>
      %51 = vector.broadcast %45 : vector<128x1xf32> to vector<128x128xf32>
      %52 = vector.broadcast %48 : vector<1x128xf32> to vector<128x128xf32>
      %53 = arith.mulf %51, %52 : vector<128x128xf32>
      %54 = vector.broadcast %46 : vector<128x1xf32> to vector<128x128xf32>
      %55 = vector.broadcast %49 : vector<1x128xf32> to vector<128x128xf32>
      %56 = arith.addf %54, %55 : vector<128x128xf32>
      %57 = arith.mulf %56, %44 : vector<128x128xf32>
      %58 = arith.mulf %57, %57 : vector<128x128xf32>
      %59 = arith.mulf %58, %58 : vector<128x128xf32>
      %60 = arith.mulf %59, %58 : vector<128x128xf32>
      %61 = arith.mulf %60, %60 : vector<128x128xf32>
      %cst_28 = arith.constant 2.000000e+00 : f32
      %62 = vector.broadcast %cst_28 : f32 to vector<128x128xf32>
      %63 = arith.mulf %62, %60 : vector<128x128xf32>
      %64 = arith.subf %61, %63 : vector<128x128xf32>
      %65 = arith.mulf %53, %64 : vector<128x128xf32>
      %66 = vector.broadcast %47 : vector<128x1xf32> to vector<128x128xf32>
      %67 = vector.broadcast %50 : vector<1x128xf32> to vector<128x128xf32>
      %68 = arith.mulf %66, %67 : vector<128x128xf32>
      %69 = arith.mulf %68, %44 : vector<128x128xf32>
      %cst_29 = arith.constant 0.000000e+00 : f32
      %70 = vector.broadcast %cst_29 : f32 to vector<128x128xf32>
      %71 = arith.select %39, %65, %70 : vector<128x128xi1>, vector<128x128xf32>
      %72 = vector.shape_cast %71 : vector<128x128xf32> to vector<16x8x128xf32>
      %cst_30 = arith.constant dense<0.000000e+00> : vector<8x128xf32>
      %73 = vector.multi_reduction <add>, %72, %cst_30 [0] : vector<16x8x128xf32> to vector<8x128xf32>
      %cst_31 = arith.constant 0.000000e+00 : f32
      %74 = vector.broadcast %cst_31 : f32 to vector<128x128xf32>
      %75 = arith.select %39, %69, %74 : vector<128x128xi1>, vector<128x128xf32>
      %76 = vector.shape_cast %75 : vector<128x128xf32> to vector<16x8x128xf32>
      %cst_32 = arith.constant dense<0.000000e+00> : vector<8x128xf32>
      %77 = vector.multi_reduction <add>, %76, %cst_32 [0] : vector<16x8x128xf32> to vector<8x128xf32>
      %c0_33 = arith.constant 0 : index
      %c0_34 = arith.constant 0 : index
      %c0_35 = arith.constant 0 : index
      %78 = vector.load %arg6[%c0_33, %c0_34, %c0_35] : memref<1x8x128xf32, #tpu.memory_space<vmem>>, vector<1x8x128xf32>
      %79 = vector.shape_cast %73 : vector<8x128xf32> to vector<1x8x128xf32>
      %80 = arith.addf %78, %79 : vector<1x8x128xf32>
      %c0_36 = arith.constant 0 : index
      %c0_37 = arith.constant 0 : index
      %c0_38 = arith.constant 0 : index
      %81 = vector.load %arg6[%c0_36, %c0_37, %c0_38] : memref<1x8x128xf32, #tpu.memory_space<vmem>>, vector<1x8x128xf32>
      tpu.vector_store %arg6[%c0_36, %c0_37, %c0_38], %80 {strides = array<i32>} : memref<1x8x128xf32, #tpu.memory_space<vmem>>, vector<1x8x128xf32>,
      %c0_39 = arith.constant 0 : index
      %c0_40 = arith.constant 0 : index
      %c0_41 = arith.constant 0 : index
      %82 = vector.load %arg7[%c0_39, %c0_40, %c0_41] : memref<1x8x128xf32, #tpu.memory_space<vmem>>, vector<1x8x128xf32>
      %83 = vector.shape_cast %77 : vector<8x128xf32> to vector<1x8x128xf32>
      %84 = arith.addf %82, %83 : vector<1x8x128xf32>
      %c0_42 = arith.constant 0 : index
      %c0_43 = arith.constant 0 : index
      %c0_44 = arith.constant 0 : index
      %85 = vector.load %arg7[%c0_42, %c0_43, %c0_44] : memref<1x8x128xf32, #tpu.memory_space<vmem>>, vector<1x8x128xf32>
      tpu.vector_store %arg7[%c0_42, %c0_43, %c0_44], %84 {strides = array<i32>} : memref<1x8x128xf32, #tpu.memory_space<vmem>>, vector<1x8x128xf32>,
    } else {
    }
    return
  }
  func.func @transform_0(%arg0: i32, %arg1: i32) -> (i32, i32) {
    %c0_i32 = arith.constant 0 : i32
    %c0_i32_0 = arith.constant 0 : i32
    return %arg0, %c0_i32 : i32, i32
  }
  func.func @transform_1(%arg0: i32, %arg1: i32) -> (i32, i32) {
    %c0_i32 = arith.constant 0 : i32
    %c0_i32_0 = arith.constant 0 : i32
    return %c0_i32, %arg1 : i32, i32
  }
  func.func @transform_2(%arg0: i32, %arg1: i32) -> (i32, i32) {
    %c0_i32 = arith.constant 0 : i32
    %c0_i32_0 = arith.constant 0 : i32
    return %arg0, %c0_i32 : i32, i32
  }
  func.func @transform_3(%arg0: i32, %arg1: i32) -> (i32, i32) {
    %c0_i32 = arith.constant 0 : i32
    %c0_i32_0 = arith.constant 0 : i32
    return %c0_i32, %arg1 : i32, i32
  }
  func.func @transform_4(%arg0: i32, %arg1: i32) -> (i32, i32, i32) {
    %c0_i32 = arith.constant 0 : i32
    %c0_i32_0 = arith.constant 0 : i32
    %c0_i32_1 = arith.constant 0 : i32
    return %arg0, %c0_i32, %c0_i32_0 : i32, i32, i32
  }
  func.func @transform_5(%arg0: i32, %arg1: i32) -> (i32, i32, i32) {
    %c0_i32 = arith.constant 0 : i32
    %c0_i32_0 = arith.constant 0 : i32
    %c0_i32_1 = arith.constant 0 : i32
    return %arg0, %c0_i32, %c0_i32_0 : i32, i32, i32
  }
}

</mosaic_0001>

<bundles_post_ra>
// kernel: force_field.4
= control target key start
LH: loop header
LB: loop body
LE: loop exit
PB: predicated region body
PF: predicated region fallthrough
CT: control target
= control target key end

     0   :  { %s188_s0 = inlined_call_operand.vmem [shape: f32[3,510], index: 0, kind: input, shape index: {}]   ;;  %s189_s1 = inlined_call_operand.vmem [shape: f32[3,510], index: 1, kind: input, shape index: {}]   ;;  %s190_s2 = inlined_call_operand.vmem [shape: f32[1,510], index: 2, kind: input, shape index: {}]   ;;  %s191_s3 = inlined_call_operand.vmem [shape: f32[1,510], index: 3, kind: input, shape index: {}]   ;;  %s192_s4 = inlined_call_operand.hbm [shape: f32[1,1], index: 4, kind: output, shape index: {}]  }
   0x1   :  { %v18_v0 = vld [vmem:[%s188_s0] ss:$4 sm:$0xf]  ;;  %v104_v3 = vld [vmem:[%s188_s0 + $0x1] ss:$4 sm:$0xf] }
   0x2   :  { %v19_v1 = vld [vmem:[%s189_s1] ss:$4 sm:$0xf]  ;;  %v105_v4 = vld [vmem:[%s189_s1 + $0x1] ss:$4 sm:$0xf] }
   0x3   :  { %v20_v2 = vsub.f32 %v18_v0, %v19_v1  ;;  %v25_v5 = vsub.f32 %v104_v3, %v105_v4  ;;  %v106_v6 = vld [vmem:[%s188_s0 + $0x2] ss:$4 sm:$0xf] }
   0x4   :  { %v107_v7 = vld [vmem:[%s189_s1 + $0x2] ss:$4 sm:$0xf] }
   0x5   :  { %v30_v8 = vsub.f32 %v106_v6, %v107_v7  ;;  %v31_v9 = vmul.f32 %v20_v2, %v20_v2  ;;  %v32_v10 = vmul.f32 %v25_v5, %v25_v5 }
   0x6   :  { %9 = vsyncpa [#allocation3], 0  ;;  %v49_v14 = vlaneseq  ;;  %v44_v18 = vld [vmem:[%s191_s3] sm:$0xf]  ;;  %vm69_vm2 = vcmask 1040384   ;;  %vm75_vm3 = vcmask 1024000  }
   0x7   :  { %v34_v11 = vmul.f32 %v30_v8, %v30_v8  ;;  %v33_v12 = vadd.f32 %v32_v10, %v31_v9  ;;  %v43_v23 = vld [vmem:[%s190_s2] sm:$0xf]  ;;  %s135_s2 = smov [#allocation2]   ;;  %vm88_vm4 = vcmask 0  }
   0x8   :  { %v50_v19 = vshrl.u32 %v49_v14, 7  ;;  %s96_s3 = sshll.u32 %s135_s2, 4  ;;  %s97_s3 = int_to_ptr.vmem [resolvable:$true] %s96_s3 }
   0x9   :  { %v35_v13 = vadd.f32 %v34_v11, %v33_v12  ;;  %s113_s30 = scalar_lea.vmem %s97_s3, 16  ;;  %s117_s5 = scalar_lea.vmem %s97_s3, 32 }
   0xa   :  { %v51_v24 = vsub.s32 0, %v50_v19  ;;  %v55_v26 = vsub.s32 1, %v50_v19  ;;  %v59_v27 = vsub.s32 2, %v50_v19  ;;  %v63_v28 = vsub.s32 3, %v50_v19  ;;  %p114_p0 = scmp.ne.s32.totalorder %s97_s3, %s113_s30  ;;  %p118_p1 = scmp.lt.s32.totalorder %s97_s3, %s97_s3 }
   0xb   :  { %111 = vrsqrt.f32 %v35_v13  ;;  %vm38_vm0 = vcmp.eq.f32.partialorder %v35_v13, inf  ;;  %v41_v16 = vand.u32 2147483648, %v35_v13  ;;  %vm40_vm1 = vcmp.eq.f32.partialorder %v35_v13, 0.0  ;;  %p119_p2 = scmp.lt.s32.totalorder %s117_s5, %s113_s30 }
   0xd   :  { %p120_p3 = por %p119_p2, %p118_p1 }
   0xf   :  { %p121_p4 = pnand %p120_p3, %p114_p0 }
  0x18   :  { %v112_v15 = vpop.eup %111 }
  0x19   :  { %v37_v17 = vmul.f32 %v112_v15, %v35_v13 }
  0x1b   :  { %v39_v20 = vsel %vm38_vm0, %v35_v13, %v37_v17 }
  0x1c   :  { %v42_v21 = vsel %vm40_vm1, %v41_v16, %v39_v20 }
  0x1d   :  { %v45_v22 = vsub.f32 %v42_v21, %v44_v18 }
  0x1f   :  { %v46_v25 = vmul.f32 %v45_v22, %v45_v22 }
  0x21   :  { %v47_v29 = vmul.f32 %v46_v25, %v43_v23 }
  0x23   :  { %v52_v30 = vrot.slane %v47_v29, %v51_v24  ;;  %v56_v31 = vrot.slane %v47_v29, %v55_v26  ;;  %v60_v32 = vrot.slane %v47_v29, %v59_v27  ;;  %v64_v33 = vrot.slane %v47_v29, %v63_v28 }
  0x25   :  { %v70_v34 = vsel %vm69_vm2, %v52_v30, 0.0  ;;  %v71_v35 = vsel %vm69_vm2, %v56_v31, 0.0  ;;  %v73_v36 = vsel %vm69_vm2, %v60_v32, 0.0  ;;  %v76_v38 = vsel %vm75_vm3, %v64_v33, 0.0 }
  0x26   :  { %v72_v37 = vadd.f32 %v71_v35, %v70_v34 }
  0x28   :  { %v74_v39 = vadd.f32 %v73_v36, %v72_v37 }
  0x2a   :  { %v77_v40 = vadd.f32 %v76_v38, %v74_v39 }
  0x2c   :  { %78 = vadd.xlane.f32.xlu0 %v77_v40 }
  0xb5   :  { %v79_v41 = vpop.xlane.xlu0 %78 }
  0xb6   :  { %v80_v42 = vrot.slane %v79_v41, 4 }
  0xb8   :  { %v81_v43 = vadd.f32 %v80_v42, %v79_v41 }
  0xba   :  { %v82_v44 = vrot.slane %v81_v43, 2 }
  0xbc   :  { %v83_v45 = vadd.f32 %v82_v44, %v81_v43 }
  0xbe   :  { %v84_v46 = vrot.slane %v83_v45, 1 }
  0xc0   :  { %v85_v47 = vadd.f32 %v84_v46, %v83_v45 }
  0xc2   :  { %108 = vpush %v85_v47 }
  0xf3   :  { %s109_s29 = spop %108 }
  0xf4   :  { %v87_v48 = vstv %s109_s29 }
  0xf5   :  { %89 = vst.msk [vmem:[#allocation2] sm:$0x1] %vm88_vm4, %v87_v48 }
  0xf6   :  { %124 = shalt.err (!%p121_p4)
}
  0xf7   :  { %99 = dma.vmem_to_hbm [thread:$0]  %s97_s3, 16, %s192_s4, [#allocation3]  }
  0xf8   :  { %133 = dma.done.wait [#allocation3], 16  }
  0xf9   :  { %134 = vsyncadd [#allocation3], 4294967280 }
  0xfa   :  { %103 = vsyncpa [#allocation3], 1 }

// kernel: force_field.3
= control target key start
LH: loop header
LB: loop body
LE: loop exit
PB: predicated region body
PF: predicated region fallthrough
CT: control target
= control target key end

     0   :  { %s188_s0 = inlined_call_operand.vmem [shape: f32[3,511], index: 0, kind: input, shape index: {}]   ;;  %s189_s1 = inlined_call_operand.vmem [shape: f32[3,511], index: 1, kind: input, shape index: {}]   ;;  %s190_s2 = inlined_call_operand.vmem [shape: f32[1,511], index: 2, kind: input, shape index: {}]   ;;  %s191_s3 = inlined_call_operand.vmem [shape: f32[1,511], index: 3, kind: input, shape index: {}]   ;;  %s192_s4 = inlined_call_operand.hbm [shape: f32[1,1], index: 4, kind: output, shape index: {}]  }
   0x1   :  { %v18_v0 = vld [vmem:[%s188_s0] ss:$4 sm:$0xf]  ;;  %v104_v3 = vld [vmem:[%s188_s0 + $0x1] ss:$4 sm:$0xf] }
   0x2   :  { %v19_v1 = vld [vmem:[%s189_s1] ss:$4 sm:$0xf]  ;;  %v105_v4 = vld [vmem:[%s189_s1 + $0x1] ss:$4 sm:$0xf] }
   0x3   :  { %v20_v2 = vsub.f32 %v18_v0, %v19_v1  ;;  %v25_v5 = vsub.f32 %v104_v3, %v105_v4  ;;  %v106_v6 = vld [vmem:[%s188_s0 + $0x2] ss:$4 sm:$0xf] }
   0x4   :  { %v107_v7 = vld [vmem:[%s189_s1 + $0x2] ss:$4 sm:$0xf] }
   0x5   :  { %v30_v8 = vsub.f32 %v106_v6, %v107_v7  ;;  %v31_v9 = vmul.f32 %v20_v2, %v20_v2  ;;  %v32_v10 = vmul.f32 %v25_v5, %v25_v5 }
   0x6   :  { %9 = vsyncpa [#allocation3], 0  ;;  %v49_v14 = vlaneseq  ;;  %v44_v18 = vld [vmem:[%s191_s3] sm:$0xf]  ;;  %vm69_vm2 = vcmask 1040384   ;;  %vm75_vm3 = vcmask 1032192  }
   0x7   :  { %v34_v11 = vmul.f32 %v30_v8, %v30_v8  ;;  %v33_v12 = vadd.f32 %v32_v10, %v31_v9  ;;  %v43_v23 = vld [vmem:[%s190_s2] sm:$0xf]  ;;  %s135_s2 = smov [#allocation2]   ;;  %vm88_vm4 = vcmask 0  }
   0x8   :  { %v50_v19 = vshrl.u32 %v49_v14, 7  ;;  %s96_s3 = sshll.u32 %s135_s2, 4  ;;  %s97_s3 = int_to_ptr.vmem [resolvable:$true] %s96_s3 }
   0x9   :  { %v35_v13 = vadd.f32 %v34_v11, %v33_v12  ;;  %s113_s30 = scalar_lea.vmem %s97_s3, 16  ;;  %s117_s5 = scalar_lea.vmem %s97_s3, 32 }
   0xa   :  { %v51_v24 = vsub.s32 0, %v50_v19  ;;  %v55_v26 = vsub.s32 1, %v50_v19  ;;  %v59_v27 = vsub.s32 2, %v50_v19  ;;  %v63_v28 = vsub.s32 3, %v50_v19  ;;  %p114_p0 = scmp.ne.s32.totalorder %s97_s3, %s113_s30  ;;  %p118_p1 = scmp.lt.s32.totalorder %s97_s3, %s97_s3 }
   0xb   :  { %111 = vrsqrt.f32 %v35_v13  ;;  %vm38_vm0 = vcmp.eq.f32.partialorder %v35_v13, inf  ;;  %v41_v16 = vand.u32 2147483648, %v35_v13  ;;  %vm40_vm1 = vcmp.eq.f32.partialorder %v35_v13, 0.0  ;;  %p119_p2 = scmp.lt.s32.totalorder %s117_s5, %s113_s30 }
   0xd   :  { %p120_p3 = por %p119_p2, %p118_p1 }
   0xf   :  { %p121_p4 = pnand %p120_p3, %p114_p0 }
  0x18   :  { %v112_v15 = vpop.eup %111 }
  0x19   :  { %v37_v17 = vmul.f32 %v112_v15, %v35_v13 }
  0x1b   :  { %v39_v20 = vsel %vm38_vm0, %v35_v13, %v37_v17 }
  0x1c   :  { %v42_v21 = vsel %vm40_vm1, %v41_v16, %v39_v20 }
  0x1d   :  { %v45_v22 = vsub.f32 %v42_v21, %v44_v18 }
  0x1f   :  { %v46_v25 = vmul.f32 %v45_v22, %v45_v22 }
  0x21   :  { %v47_v29 = vmul.f32 %v46_v25, %v43_v23 }
  0x23   :  { %v52_v30 = vrot.slane %v47_v29, %v51_v24  ;;  %v56_v31 = vrot.slane %v47_v29, %v55_v26  ;;  %v60_v32 = vrot.slane %v47_v29, %v59_v27  ;;  %v64_v33 = vrot.slane %v47_v29, %v63_v28 }
  0x25   :  { %v70_v34 = vsel %vm69_vm2, %v52_v30, 0.0  ;;  %v71_v35 = vsel %vm69_vm2, %v56_v31, 0.0  ;;  %v73_v36 = vsel %vm69_vm2, %v60_v32, 0.0  ;;  %v76_v38 = vsel %vm75_vm3, %v64_v33, 0.0 }
  0x26   :  { %v72_v37 = vadd.f32 %v71_v35, %v70_v34 }
  0x28   :  { %v74_v39 = vadd.f32 %v73_v36, %v72_v37 }
  0x2a   :  { %v77_v40 = vadd.f32 %v76_v38, %v74_v39 }
  0x2c   :  { %78 = vadd.xlane.f32.xlu0 %v77_v40 }
  0xb5   :  { %v79_v41 = vpop.xlane.xlu0 %78 }
  0xb6   :  { %v80_v42 = vrot.slane %v79_v41, 4 }
  0xb8   :  { %v81_v43 = vadd.f32 %v80_v42, %v79_v41 }
  0xba   :  { %v82_v44 = vrot.slane %v81_v43, 2 }
  0xbc   :  { %v83_v45 = vadd.f32 %v82_v44, %v81_v43 }
  0xbe   :  { %v84_v46 = vrot.slane %v83_v45, 1 }
  0xc0   :  { %v85_v47 = vadd.f32 %v84_v46, %v83_v45 }
  0xc2   :  { %108 = vpush %v85_v47 }
  0xf3   :  { %s109_s29 = spop %108 }
  0xf4   :  { %v87_v48 = vstv %s109_s29 }
  0xf5   :  { %89 = vst.msk [vmem:[#allocation2] sm:$0x1] %vm88_vm4, %v87_v48 }
  0xf6   :  { %124 = shalt.err (!%p121_p4)
}
  0xf7   :  { %99 = dma.vmem_to_hbm [thread:$0]  %s97_s3, 16, %s192_s4, [#allocation3]  }
  0xf8   :  { %133 = dma.done.wait [#allocation3], 16  }
  0xf9   :  { %134 = vsyncadd [#allocation3], 4294967280 }
  0xfa   :  { %103 = vsyncpa [#allocation3], 1 }

// kernel: force_field.5
= control target key start
LH: loop header
LB: loop body
LE: loop exit
PB: predicated region body
PF: predicated region fallthrough
CT: control target
= control target key end

     0   :  { %s1624_s18 = smov 0   ;;  %s1626_s19 = smov 0   ;;  %s2472_s0 = inlined_call_operand.vmem [shape: f32[512,3], index: 0, kind: input, shape index: {}]   ;;  %s2473_s1 = inlined_call_operand.vmem [shape: f32[3,512], index: 1, kind: input, shape index: {}]   ;;  %s2474_s2 = inlined_call_operand.vmem [shape: f32[512,3], index: 2, kind: input, shape index: {}]   ;;  %s2475_s3 = inlined_call_operand.vmem [shape: f32[3,512], index: 3, kind: input, shape index: {}]   ;;  %s2476_s4 = inlined_call_operand.vmem [shape: f32[4,8,128], index: 4, kind: output, shape index: {0}]   ;;  %s2477_s5 = inlined_call_operand.vmem [shape: f32[4,8,128], index: 5, kind: output, shape index: {1}]  }
   0x1   :  { %s1628_s20 = smov 0   ;;  %s1630_s21 = smov 0  }
   0x2   :  { %s1632_s22 = smov 0  }
   0x3 LB: > { %s25_s23 = sadd.s32 1, %s1579_s20  ;;  %s28_s24 = sadd.s32 1, %s1583_s21  ;;  %s1587_s22 = sphi %s1632_s22, %s16_s22   ;;  %s1583_s21 = sphi %s1630_s21, %s2515_s21   ;;  %s1579_s20 = sphi %s1628_s20, %s2514_s20   ;;  %s1575_s19 = sphi %s1626_s19, %s2513_s19   ;;  %s1571_s18 = sphi %s1624_s18, %s2512_s18  }
   0x4   : > { %p26_p0 = scmp.ge.s32.totalorder %s25_s23, 4  ;;  %p1437_p1 = scmp.ge.s32.totalorder %s1587_s22, 1 }
   0x5   : > { %p232_p2 = scmp.lt.s32.totalorder %s1587_s22, 17 }
   0x6   : > { %s2517_s23 = smov (%p26_p0, %s25_s23), 0  ;;  %s2519_s24 = smov (!%p26_p0, %s28_s24), %s1583_s21 }
   0x7   : > { %p233_p3 = pnand %p1437_p1, %p232_p2  ;;  %p30_p4 = scmp.ge.s32.totalorder %s2519_s24, 4 }
   0x8   : > { %s1438_s25 = sshll.u32 (!%p233_p3), %s1575_s19, 4  ;;  %p282_p5 = scmp.lt.s32.totalorder (!%p233_p3), %s1571_s18, 3 }
   0x9   : > { %s2521_s24 = smov (%p30_p4, %s2519_s24), 0  ;;  %236 = sbr.rel (%p233_p3) target bundleno = 377 (0x179), region = 36 }
   0xa   : > { %p277_p6 = scmp.lt.s32.totalorder (!%p233_p3), %s1438_s25, 63  ;;  %p296_p7 = scmp.lt.s32.totalorder (!%p233_p3), %s1575_s19, 3 }
   0xb   : > { %p1446_p8 = scmp.ne.s32.totalorder (!%p233_p3), %s1571_s18, 0 }
   0xe   : > { %s283_s26 = scalar_select %p282_p5, %s1571_s18, 3 }
   0xf   : > { %s2523_s25 = smov (!%p277_p6, %s1438_s25), 63 }
  0x10   : > { %s1440_s27 = sshll.u32 %s283_s26, 2  ;;  %s1439_s28 = sshll.u32 %s2523_s25, 3 }
  0x11   : > { %s1665_s6 = scalar_lea.vmem %s2473_s1, %s1440_s27  ;;  %s1670_s9 = scalar_lea.vmem %s2472_s0, %s1439_s28 }
  0x12   : > { %s1675_s12 = scalar_lea.vmem %s2474_s2, %s1439_s28  ;;  %s1680_s15 = scalar_lea.vmem %s2475_s3, %s1440_s27 }
  0x13   : > { %s297_s16 = scalar_select %p296_p7, %s1575_s19, 3 }
  0x14   : > { %307 = sbr.rel (%p1446_p8) target bundleno = 27 (0x1b), region = 40 }
  0x15   : > { %s1444_s17 = sshll.u32 %s297_s16, 3 }
  0x16   : > { %s1686_s29 = scalar_lea.vmem %s2476_s4, %s1444_s17  ;;  %s1691_s8 = scalar_lea.vmem %s2477_s5, %s1444_s17 }
  0x19   : > { %v1589_v0 = vmov 0.0  }
  0x1a   : > { %308 = vst [vmem:[%s1686_s29] sm:$0xff] %v1589_v0  ;;  %309 = vst [vmem:[%s1691_s8] sm:$0xff] %v1589_v0 }
  0x1b PF: > { %s1459_s27 = sshll.u32 %s1571_s18, 7  ;;  %s1448_s28 = sshll.u32 %s1575_s19, 7 }
  0x1c   : > { %s1460_s10 = sadd.s32 128, %s1459_s27 }
  0x1d   : > { %p1449_p9 = scmp.le.s32.totalorder %s1460_s10, %s1448_s28 }
  0x1f   : > { %316 = sbr.rel (%p1449_p9) target bundleno = 377 (0x179), region = 44 }
  0x24   : > { %v1703_v1 = vld [vmem:[%s1670_s9 + $0x10] sm:$0xff]  ;;  %v1706_v2 = vld [vmem:[%s1670_s9] sm:$0xff]  ;;  %v1590_v3 = vmov 0   ;;  %v320_v4 = vld [vmem:[%s1670_s9 + $0x18] sm:$0xff]  ;;  %v1591_v19 = vmov 1   ;;  %v1592_v27 = vmov 2  }
  0x25   : > { %1507 = vset.pattern.permute.xlu1 %v1590_v3  ;;  %1506 = vset.pattern.permute.xlu0 %v1590_v3  ;;  %v1714_v5 = vld [vmem:[%s1670_s9 + $0x8] sm:$0xff]  ;;  %v1719_v7 = vld [vmem:[%s1670_s9 + $0x20] sm:$0xff]  ;;  %v324_v8 = vld [vmem:[%s1670_s9 + $0x38] sm:$0xff] }
  0x26   : > { %346 = vperm.xlu1 %1507, %v1703_v1   ;;  %336 = vperm.xlu0 %1506, %v1706_v2   ;;  %v322_v6 = vld [vmem:[%s1670_s9 + $0x28] sm:$0xff]  ;;  %v1724_v9 = vld [vmem:[%s1670_s9 + $0x30] sm:$0xff]  ;;  %v1729_v11 = vld [vmem:[%s1670_s9 + $0x40] sm:$0xff] }
  0x27   : > { %v326_v10 = vld [vmem:[%s1670_s9 + $0x48] sm:$0xff]  ;;  %v328_v12 = vld [vmem:[%s1670_s9 + $0x58] sm:$0xff]  ;;  %v1734_v13 = vld [vmem:[%s1670_s9 + $0x50] sm:$0xff] }
  0x28   : > { %v330_v14 = vld [vmem:[%s1670_s9 + $0x68] sm:$0xff]  ;;  %v1739_v15 = vld [vmem:[%s1670_s9 + $0x60] sm:$0xff]  ;;  %v332_v16 = vld [vmem:[%s1670_s9 + $0x78] sm:$0xff] }
  0x29   : > { %v1744_v17 = vld [vmem:[%s1670_s9 + $0x70] sm:$0xff]  ;;  %v1748_v18 = vld [vmem:[%s1675_s12] sm:$0xff]  ;;  %v1754_v20 = vld [vmem:[%s1675_s12 + $0x18] sm:$0xff] }
  0x2a   : > { %351 = vperm.xlu1 %1507, %v320_v4   ;;  %341 = vperm.xlu0 %1506, %v1714_v5   ;;  %v1759_v21 = vld [vmem:[%s1675_s12 + $0x28] sm:$0xff]  ;;  %v1764_v22 = vld [vmem:[%s1675_s12 + $0x38] sm:$0xff]  ;;  %v807_v29 = vld [vmem:[%s1675_s12 + $0x20] sm:$0xff] }
  0x2b   : > { %v1769_v23 = vld [vmem:[%s1675_s12 + $0x48] sm:$0xff]  ;;  %v1774_v24 = vld [vmem:[%s1675_s12 + $0x58] sm:$0xff]  ;;  %v809_v30 = vld [vmem:[%s1675_s12 + $0x30] sm:$0xff] }
  0x2c   : > { %v1779_v25 = vld [vmem:[%s1675_s12 + $0x68] sm:$0xff]  ;;  %v1784_v26 = vld [vmem:[%s1675_s12 + $0x78] sm:$0xff]  ;;  %v805_v31 = vld [vmem:[%s1675_s12 + $0x10] sm:$0xff] }
  0x2d   : > { %v1794_v28 = vld [vmem:[%s1675_s12 + $0x8] sm:$0xff]  ;;  %v811_v32 = vld [vmem:[%s1675_s12 + $0x40] sm:$0xff]  ;;  %v1808_v33 = vld [vmem:[%s1675_s12 + $0x50] sm:$0xff] }
  0x2e   : > { %361 = vperm.xlu1 %1507, %v322_v6   ;;  %356 = vperm.xlu0 %1506, %v1719_v7   ;;  %v1817_v36 = vld [vmem:[%s1675_s12 + $0x60] sm:$0xff]  ;;  %v1824_v39 = vld [vmem:[%s1675_s12 + $0x70] sm:$0xff] }
  0x2f   : > { %v1851_v52 = vld [vmem:[%s1665_s6] ss:$0 sm:$0xff]  ;;  %v1855_v53 = vld [vmem:[%s1665_s6 + $0x1] ss:$0 sm:$0xff] }
  0x32   : > { %371 = vperm.xlu1 %1507, %v324_v8   ;;  %366 = vperm.xlu0 %1506, %v1724_v9  }
  0x36   : > { %381 = vperm.xlu1 %1507, %v326_v10   ;;  %376 = vperm.xlu0 %1506, %v1729_v11  }
  0x3a   : > { %391 = vperm.xlu1 %1507, %v328_v12   ;;  %386 = vperm.xlu0 %1506, %v1734_v13  }
  0x3e   : > { %401 = vperm.xlu1 %1507, %v330_v14   ;;  %396 = vperm.xlu0 %1506, %v1739_v15  }
  0x42   : > { %411 = vperm.xlu1 %1507, %v332_v16   ;;  %406 = vperm.xlu0 %1506, %v1744_v17  }
  0x46   : > { %1508 = vset.pattern.permute.xlu1 %v1591_v19  ;;  %824 = vperm.xlu0 %1506, %v1748_v18  }
  0x47   : > { %472 = vperm.xlu1 %1508, %v1714_v5  }
  0x4a   : > { %839 = vperm.xlu0 %1506, %v1754_v20  }
  0x4b   : > { %476 = vperm.xlu1 %1508, %v1703_v1  }
  0x4e   : > { %849 = vperm.xlu0 %1506, %v1759_v21  }
  0x4f   : > { %484 = vperm.xlu1 %1508, %v1719_v7  }
  0x52   : > { %859 = vperm.xlu0 %1506, %v1764_v22  }
  0x53   : > { %492 = vperm.xlu1 %1508, %v1724_v9  }
  0x56   : > { %869 = vperm.xlu0 %1506, %v1769_v23  }
  0x57   : > { %500 = vperm.xlu1 %1508, %v1729_v11  }
  0x5a   : > { %879 = vperm.xlu0 %1506, %v1774_v24  }
  0x5b   : > { %508 = vperm.xlu1 %1508, %v1734_v13  }
  0x5e   : > { %889 = vperm.xlu0 %1506, %v1779_v25  }
  0x5f   : > { %516 = vperm.xlu1 %1508, %v1739_v15  }
  0x62   : > { %899 = vperm.xlu0 %1506, %v1784_v26  }
  0x63   : > { %524 = vperm.xlu1 %1508, %v1744_v17  }
  0x66   : > { %1511 = vset.pattern.permute.xlu0 %v1591_v19 }
  0x67   : > { %1509 = vset.pattern.permute.xlu1 %v1592_v27  ;;  %468 = vperm.xlu0 %1511, %v1706_v2  }
  0x68   : > { %585 = vperm.xlu1 %1509, %v1706_v2  }
  0x6b   : > { %480 = vperm.xlu0 %1511, %v320_v4  }
  0x6c   : > { %593 = vperm.xlu1 %1509, %v1703_v1  }
  0x6f   : > { %488 = vperm.xlu0 %1511, %v322_v6  }
  0x70   : > { %597 = vperm.xlu1 %1509, %v320_v4  }
  0x73   : > { %496 = vperm.xlu0 %1511, %v324_v8  }
  0x74   : > { %605 = vperm.xlu1 %1509, %v322_v6  }
  0x77   : > { %504 = vperm.xlu0 %1511, %v326_v10  }
  0x78   : > { %613 = vperm.xlu1 %1509, %v324_v8  }
  0x7b   : > { %512 = vperm.xlu0 %1511, %v328_v12  }
  0x7c   : > { %621 = vperm.xlu1 %1509, %v326_v10  }
  0x7f   : > { %520 = vperm.xlu0 %1511, %v330_v14  }
  0x80   : > { %629 = vperm.xlu1 %1509, %v328_v12  }
  0x83   : > { %528 = vperm.xlu0 %1511, %v332_v16  }
  0x84   : > { %637 = vperm.xlu1 %1509, %v330_v14  }
  0x87   : > { %927 = vperm.xlu0 %1511, %v1794_v28  }
  0x88   : > { %645 = vperm.xlu1 %1509, %v332_v16  }
  0x8b   : > { %939 = vperm.xlu0 %1511, %v807_v29  }
  0x8c   : > { %1510 = vset.pattern.permute.xlu1 %v1590_v3 }
  0x8d   : > { %829 = vperm.xlu1 %1510, %v1794_v28  }
  0x8f   : > { %947 = vperm.xlu0 %1511, %v809_v30  }
  0x91   : > { %834 = vperm.xlu1 %1510, %v805_v31  }
  0x93   : > { %1513 = vset.pattern.permute.xlu0 %v1592_v27 }
  0x94   : > { %589 = vperm.xlu0 %1513, %v1714_v5  }
  0x95   : > { %844 = vperm.xlu1 %1510, %v807_v29  }
  0x98   : > { %601 = vperm.xlu0 %1513, %v1719_v7  }
  0x99   : > { %854 = vperm.xlu1 %1510, %v809_v30  }
  0x9c   : > { %609 = vperm.xlu0 %1513, %v1724_v9  }
  0x9d   : > { %864 = vperm.xlu1 %1510, %v811_v32  }
  0xa0   : > { %617 = vperm.xlu0 %1513, %v1729_v11  }
  0xa1   : > { %v1811_v34 = vpop.permute.xlu1 %346  ;;  %874 = vperm.xlu1 %1510, %v1808_v33   ;;  %v1814_v35 = vpop.permute.xlu0 %336 }
  0xa4   : > { %625 = vperm.xlu0 %1513, %v1734_v13  }
  0xa5   : > { %v1820_v37 = vpop.permute.xlu1 %351  ;;  %884 = vperm.xlu1 %1510, %v1817_v36   ;;  %v342_v38 = vpop.permute.xlu0 %341 }
  0xa6   : > { %v419_v54 = vsub.f32 %v342_v38, %v1851_v52 }
  0xa8   : > { %633 = vperm.xlu0 %1513, %v1739_v15   ;;  %v435_v58 = vmul.f32 %v419_v54, %v419_v54 }
  0xa9   : > { %v1827_v40 = vpop.permute.xlu1 %361  ;;  %894 = vperm.xlu1 %1510, %v1824_v39   ;;  %v357_v41 = vpop.permute.xlu0 %356 }
  0xaa   : > { %v422_v63 = vsub.f32 %v357_v41, %v1851_v52 }
  0xac   : > { %641 = vperm.xlu0 %1513, %v1744_v17   ;;  %v438_v3 = vmul.f32 %v422_v63, %v422_v63 }
  0xad   : > { %v1831_v42 = vpop.permute.xlu1 %371  ;;  %1512 = vset.pattern.permute.xlu1 %v1591_v19  ;;  %v367_v43 = vpop.permute.xlu0 %366 }
  0xae   : > { %923 = vperm.xlu1 %1512, %v1748_v18   ;;  %v424_v4 = vsub.f32 %v367_v43, %v1851_v52 }
  0xb0   : > { %1135 = vperm.xlu0 %1513, %v1748_v18   ;;  %v440_v10 = vmul.f32 %v424_v4, %v424_v4  ;;  %v420_v4 = vsub.f32 %v1811_v34, %v1851_v52 }
  0xb1   : > { %v1836_v44 = vpop.permute.xlu1 %381  ;;  %v377_v45 = vpop.permute.xlu0 %376 }
  0xb2   : > { %931 = vperm.xlu1 %1512, %v805_v31   ;;  %v426_v11 = vsub.f32 %v377_v45, %v1851_v52 }
  0xb4   : > { %1143 = vperm.xlu0 %1513, %v805_v31   ;;  %v442_v17 = vmul.f32 %v426_v11, %v426_v11 }
  0xb5   : > { %v1838_v46 = vpop.permute.xlu1 %391  ;;  %v387_v47 = vpop.permute.xlu0 %386 }
  0xb6   : > { %935 = vperm.xlu1 %1512, %v1754_v20   ;;  %v428_v18 = vsub.f32 %v387_v47, %v1851_v52 }
  0xb8   : > { %1147 = vperm.xlu0 %1513, %v1754_v20  }
  0xb9   : > { %v1842_v48 = vpop.permute.xlu1 %401  ;;  %v397_v49 = vpop.permute.xlu0 %396 }
  0xba   : > { %943 = vperm.xlu1 %1512, %v1759_v21  }
  0xbc   : > { %1151 = vperm.xlu0 %1513, %v807_v29   ;;  %v430_v29 = vsub.f32 %v397_v49, %v1851_v52 }
  0xbd   : > { %v1845_v50 = vpop.permute.xlu1 %411  ;;  %v1847_v51 = vpop.permute.xlu0 %406 }
  0xbe   : > { %951 = vperm.xlu1 %1512, %v1764_v22   ;;  %v446_v41 = vmul.f32 %v430_v29, %v430_v29  ;;  %v432_v43 = vsub.f32 %v1847_v51, %v1851_v52 }
  0xc0   : > { %1155 = vperm.xlu0 %1513, %v1759_v21  }
  0xc1   : > { %v1858_v55 = vpop.permute.xlu0 %824 }
  0xc2   : > { %v473_v56 = vpop.permute.xlu1 %472  ;;  %1514 = vset.pattern.permute.xlu1 %v1592_v27 }
  0xc3   : > { %v536_v57 = vsub.f32 %v473_v56, %v1855_v53  ;;  %1139 = vperm.xlu1 %1514, %v1794_v28   ;;  %v444_v28 = vmul.f32 %v428_v18, %v428_v18 }
  0xc4   : > { %1159 = vperm.xlu0 %1513, %v809_v30  }
  0xc5   : > { %v552_v59 = vmul.f32 %v536_v57, %v536_v57  ;;  %v1863_v60 = vpop.permute.xlu0 %839  ;;  %v418_v57 = vsub.f32 %v1814_v35, %v1851_v52 }
  0xc6   : > { %v477_v61 = vpop.permute.xlu1 %476 }
  0xc7   : > { %v1865_v62 = vadd.f32 %v552_v59, %v435_v58  ;;  %1515 = vset.pattern.permute.xlu1 %v1591_v19  ;;  %v1917_v59 = vld [vmem:[%s1665_s6 + $0x2] ss:$0 sm:$0xff]  ;;  %v537_v63 = vsub.f32 %v477_v61, %v1855_v53  ;;  %v434_v35 = vmul.f32 %v418_v57, %v418_v57  ;;  %v425_v57 = vsub.f32 %v1831_v42, %v1851_v52 }
  0xc8   : > { %955 = vperm.xlu1 %1515, %v811_v32   ;;  %1163 = vperm.xlu0 %1513, %v1764_v22  }
  0xc9   : > { %v1870_v0 = vpop.permute.xlu0 %849 }
  0xca   : > { %v485_v1 = vpop.permute.xlu1 %484 }
  0xcb   : > { %v539_v2 = vsub.f32 %v485_v1, %v1855_v53 }
  0xcc   : > { %959 = vperm.xlu1 %1515, %v1769_v23   ;;  %1167 = vperm.xlu0 %1513, %v811_v32  }
  0xcd   : > { %v555_v5 = vmul.f32 %v539_v2, %v539_v2  ;;  %v1875_v6 = vpop.permute.xlu0 %859 }
  0xce   : > { %v493_v7 = vpop.permute.xlu1 %492 }
  0xcf   : > { %v1877_v8 = vadd.f32 %v555_v5, %v438_v3  ;;  %v541_v9 = vsub.f32 %v493_v7, %v1855_v53 }
  0xd0   : > { %963 = vperm.xlu1 %1515, %v1808_v33   ;;  %1171 = vperm.xlu0 %1513, %v1769_v23  }
  0xd1   : > { %v557_v12 = vmul.f32 %v541_v9, %v541_v9  ;;  %v1883_v13 = vpop.permute.xlu0 %869  ;;  %v553_v9 = vmul.f32 %v537_v63, %v537_v63 }
  0xd2   : > { %v501_v14 = vpop.permute.xlu1 %500 }
  0xd3   : > { %v1885_v15 = vadd.f32 %v557_v12, %v440_v10  ;;  %v543_v16 = vsub.f32 %v501_v14, %v1855_v53 }
  0xd4   : > { %967 = vperm.xlu1 %1515, %v1774_v24   ;;  %1179 = vperm.xlu0 %1513, %v1774_v24  }
  0xd5   : > { %v559_v19 = vmul.f32 %v543_v16, %v543_v16  ;;  %v1891_v20 = vpop.permute.xlu0 %879  ;;  %v436_v16 = vmul.f32 %v420_v4, %v420_v4  ;;  %v441_v4 = vmul.f32 %v425_v57, %v425_v57 }
  0xd6   : > { %2490 = vst [vmem:[#allocation2_spill] sm:$0xff] %v1891_v20  ;;  %v509_v21 = vpop.permute.xlu1 %508 }
  0xd7   : > { %v1893_v22 = vadd.f32 %v559_v19, %v442_v17  ;;  %v545_v23 = vsub.f32 %v509_v21, %v1855_v53  ;;  %v421_v17 = vsub.f32 %v1820_v37, %v1851_v52 }
  0xd8   : > { %971 = vperm.xlu1 %1515, %v1817_v36   ;;  %1187 = vperm.xlu0 %1513, %v1779_v25  }
  0xd9   : > { %v561_v30 = vmul.f32 %v545_v23, %v545_v23  ;;  %v1899_v24 = vpop.permute.xlu0 %889 }
  0xda   : > { %2491 = vst [vmem:[#allocation3_spill] sm:$0xff] %v1899_v24  ;;  %v517_v31 = vpop.permute.xlu1 %516 }
  0xdb   : > { %v1901_v32 = vadd.f32 %v561_v30, %v444_v28  ;;  %v547_v38 = vsub.f32 %v517_v31, %v1855_v53  ;;  %v437_v30 = vmul.f32 %v421_v17, %v421_v17  ;;  %v423_v31 = vsub.f32 %v1827_v40, %v1851_v52 }
  0xdc   : > { %975 = vperm.xlu1 %1515, %v1779_v25   ;;  %1195 = vperm.xlu0 %1513, %v1784_v26   ;;  %v448_v25 = vmul.f32 %v432_v43, %v432_v43 }
  0xdd   : > { %v563_v45 = vmul.f32 %v547_v38, %v547_v38  ;;  %v1908_v47 = vpop.permute.xlu0 %899 }
  0xde   : > { %2492 = vst [vmem:[#allocation4_spill] sm:$0xff] %v1908_v47  ;;  %v525_v49 = vpop.permute.xlu1 %524 }
  0xdf   : > { %v1910_v54 = vadd.f32 %v563_v45, %v446_v41  ;;  %v549_v56 = vsub.f32 %v525_v49, %v1855_v53 }
  0xe0   : > { %979 = vperm.xlu1 %1515, %v1824_v39  }
  0xe1   : > { %v565_v58 = vmul.f32 %v549_v56, %v549_v56  ;;  %v439_v56 = vmul.f32 %v423_v31, %v423_v31 }
  0xe2   : > { %v469_v51 = vpop.permute.xlu0 %468 }
  0xe3   : > { %v1920_v1 = vadd.f32 %v565_v58, %v448_v25  ;;  %v535_v2 = vsub.f32 %v469_v51, %v1855_v53  ;;  %v586_v3 = vpop.permute.xlu1 %585 }
  0xe4   : > { %v652_v5 = vsub.f32 %v586_v3, %v1917_v59  ;;  %983 = vperm.xlu1 %1515, %v1784_v26   ;;  %v569_v26 = vadd.f32 %v553_v9, %v436_v16 }
  0xe5   : > { %v551_v7 = vmul.f32 %v535_v2, %v535_v2 }
  0xe6   : > { %v668_v10 = vmul.f32 %v652_v5, %v652_v5  ;;  %v481_v11 = vpop.permute.xlu0 %480  ;;  %v427_v5 = vsub.f32 %v1836_v44, %v1851_v52 }
  0xe7   : > { %v567_v12 = vadd.f32 %v551_v7, %v434_v35  ;;  %v538_v61 = vsub.f32 %v481_v11, %v1855_v53  ;;  %v594_v14 = vpop.permute.xlu1 %593 }
  0xe8   : > { %v654_v18 = vsub.f32 %v594_v14, %v1917_v59  ;;  %1516 = vset.pattern.permute.xlu1 %v1592_v27  ;;  %v429_v14 = vsub.f32 %v1838_v46, %v1851_v52 }
  0xe9   : > { %v1932_v34 = vadd.f32 %v668_v10, %v567_v12  ;;  %1175 = vperm.xlu1 %1516, %v1808_v33   ;;  %v554_v19 = vmul.f32 %v538_v61, %v538_v61  ;;  %v443_v61 = vmul.f32 %v427_v5, %v427_v5 }
  0xea   : > { %v670_v21 = vmul.f32 %v654_v18, %v654_v18  ;;  %v489_v23 = vpop.permute.xlu0 %488 }
  0xeb   : > { %v540_v28 = vsub.f32 %v489_v23, %v1855_v53  ;;  %v598_v29 = vpop.permute.xlu1 %597  ;;  %v570_v27 = vadd.f32 %v554_v19, %v437_v30 }
  0xec   : > { %v1938_v37 = vadd.f32 %v670_v21, %v569_v26  ;;  %v655_v38 = vsub.f32 %v598_v29, %v1917_v59  ;;  %v431_v29 = vsub.f32 %v1842_v48, %v1851_v52  ;;  %v700_v48 = vlaneseq }
  0xed   : > { %1183 = vperm.xlu1 %1516, %v1817_v36   ;;  %v556_v41 = vmul.f32 %v540_v28, %v540_v28  ;;  %v445_v28 = vmul.f32 %v429_v14, %v429_v14 }
  0xee   : > { %v671_v33 = vmul.f32 %v655_v38, %v655_v38  ;;  %v497_v43 = vpop.permute.xlu0 %496 }
  0xef   : > { %v542_v45 = vsub.f32 %v497_v43, %v1855_v53  ;;  %v606_v49 = vpop.permute.xlu1 %605  ;;  %v572_v58 = vadd.f32 %v556_v41, %v439_v56 }
  0xf0   : > { %v1945_v25 = vadd.f32 %v671_v33, %v570_v27  ;;  %v657_v40 = vsub.f32 %v606_v49, %v1917_v59  ;;  %v433_v49 = vsub.f32 %v1845_v50, %v1851_v52 }
  0xf1   : > { %1191 = vperm.xlu1 %1516, %v1824_v39   ;;  %v558_v63 = vmul.f32 %v542_v45, %v542_v45  ;;  %v447_v45 = vmul.f32 %v431_v29, %v431_v29 }
  0xf2   : > { %v673_v36 = vmul.f32 %v657_v40, %v657_v40  ;;  %v505_v51 = vpop.permute.xlu0 %504 }
  0xf3   : > { %v544_v2 = vsub.f32 %v505_v51, %v1855_v53  ;;  %v614_v3 = vpop.permute.xlu1 %613  ;;  %v574_v7 = vadd.f32 %v558_v63, %v441_v4  ;;  %v1978_v4 = vshrl.u32 %v700_v48, 7 }
  0xf4   : > { %v1952_v35 = vadd.f32 %v673_v36, %v572_v58  ;;  %v659_v42 = vsub.f32 %v614_v3, %v1917_v59 }
  0xf5   : > { %v560_v9 = vmul.f32 %v544_v2, %v544_v2  ;;  %v449_v2 = vmul.f32 %v433_v49, %v433_v49 }
  0xf6   : > { %v675_v10 = vmul.f32 %v659_v42, %v659_v42  ;;  %v513_v11 = vpop.permute.xlu0 %512 }
  0xf7   : > { %v546_v39 = vsub.f32 %v513_v11, %v1855_v53  ;;  %v622_v12 = vpop.permute.xlu1 %621  ;;  %v576_v44 = vadd.f32 %v560_v9, %v443_v61  ;;  %v702_v9 = vadd.s32 8, %v1978_v4  ;;  %v703_v61 = vadd.s32 16, %v1978_v4 }
  0xf8   : > { %v1958_v16 = vadd.f32 %v675_v10, %v574_v7  ;;  %v661_v17 = vsub.f32 %v622_v12, %v1917_v59  ;;  %v736_v10 = vand.u32 127, %v700_v48  ;;  %v737_v12 = vstv %s1459_s27 }
  0xf9   : > { %v562_v18 = vmul.f32 %v546_v39, %v546_v39  ;;  %v1991_v39 = vstv %s1448_s28 }
  0xfa   : > { %v677_v26 = vmul.f32 %v661_v17, %v661_v17  ;;  %v521_v19 = vpop.permute.xlu0 %520  ;;  %v1999_v17 = vadd.s32 %v1991_v39, %v702_v9 }
  0xfb   : > { %v548_v21 = vsub.f32 %v521_v19, %v1855_v53  ;;  %v630_v23 = vpop.permute.xlu1 %629  ;;  %v578_v46 = vadd.f32 %v562_v18, %v445_v28  ;;  %v2004_v18 = vadd.s32 %v1991_v39, %v1978_v4  ;;  %v704_v19 = vadd.s32 24, %v1978_v4 }
  0xfc   : > { %v1964_v30 = vadd.f32 %v677_v26, %v576_v44  ;;  %v663_v31 = vsub.f32 %v630_v23, %v1917_v59  ;;  %v705_v44 = vadd.s32 32, %v1978_v4  ;;  %v2006_v26 = vadd.s32 %v737_v12, %v736_v10 }
  0xfd   : > { %v564_v38 = vmul.f32 %v548_v21, %v548_v21  ;;  %v2010_v21 = vadd.s32 %v1991_v39, %v703_v61  ;;  %v714_v10 = vadd.s32 104, %v1978_v4 }
  0xfe   : > { %v679_v27 = vmul.f32 %v663_v31, %v663_v31  ;;  %v529_v41 = vpop.permute.xlu0 %528  ;;  %vm740_vm0 = vcmp.gt.s32.totalorder %v2006_v26, %v1999_v17  ;;  %v2018_v31 = vadd.s32 %v1991_v39, %v705_v44  ;;  %vm739_vm1 = vcmp.gt.s32.totalorder %v2006_v26, %v2004_v18 }
  0xff   : > { %v550_v33 = vsub.f32 %v529_v41, %v1855_v53  ;;  %v638_v43 = vpop.permute.xlu1 %637  ;;  %v580_v40 = vadd.f32 %v564_v38, %v447_v45  ;;  %v2024_v38 = vadd.s32 %v1991_v39, %v704_v19  ;;  %vm741_vm2 = vcmp.gt.s32.totalorder %v2006_v26, %v2010_v21 }
 0x100   : > { %v1970_v56 = vadd.f32 %v679_v27, %v578_v46  ;;  %v665_v57 = vsub.f32 %v638_v43, %v1917_v59  ;;  %v707_v46 = vadd.s32 48, %v1978_v4  ;;  %v706_v41 = vadd.s32 40, %v1978_v4 }
 0x101   : > { %v566_v58 = vmul.f32 %v550_v33, %v550_v33  ;;  %v708_v33 = vadd.s32 56, %v1978_v4  ;;  %v1593_v43 = vmov 1.0   ;;  %vm743_vm3 = vcmp.gt.s32.totalorder %v2006_v26, %v2018_v31 }
 0x102   : > { %v681_v63 = vmul.f32 %v665_v57, %v665_v57  ;;  %v1973_v36 = vpop.permute.xlu0 %927  ;;  %v756_v45 = vsel %vm740_vm0, 0.0, %v1593_v43  ;;  %vm742_vm4 = vcmp.gt.s32.totalorder %v2006_v26, %v2024_v38  ;;  %v759_v12 = vsel %vm743_vm3, 0.0, %v1593_v43 }
 0x103   : > { %v646_v51 = vpop.permute.xlu1 %645  ;;  %v582_v50 = vadd.f32 %v566_v58, %v449_v2  ;;  %v2041_v58 = vadd.s32 %v1991_v39, %v707_v46  ;;  %v712_v2 = vadd.s32 88, %v1978_v4  ;;  %v2059_v9 = vadd.s32 %v1991_v39, %v708_v33 }
 0x104   : > { %v1975_v53 = vadd.f32 %v681_v63, %v580_v40  ;;  %v667_v3 = vsub.f32 %v646_v51, %v1917_v59  ;;  %v755_v63 = vsel %vm739_vm1, 0.0, %v1593_v43  ;;  %v710_v51 = vadd.s32 72, %v1978_v4 }
 0x105   : > { %vm745_vm5 = vcmp.gt.s32.totalorder %v2006_v26, %v2041_v58  ;;  %v2076_v46 = vadd.s32 %v1991_v39, %v712_v2  ;;  %vm746_vm7 = vcmp.gt.s32.totalorder %v2006_v26, %v2059_v9 }
 0x106   : > { %v683_v52 = vmul.f32 %v667_v3, %v667_v3  ;;  %v1980_v5 = vpop.permute.xlu0 %939 }
 0x107   : > { %2493 = vst [vmem:[#allocation5_spill] sm:$0xff] %v2076_v46  ;;  %vm750_vm9 = vcmp.gt.s32.totalorder %v2006_v26, %v2076_v46 }
 0x108   : > { %v1982_v42 = vadd.f32 %v683_v52, %v582_v50  ;;  %v1984_v7 = vpop.permute.xlu1 %829  ;;  %v2056_v52 = vadd.s32 %v1991_v39, %v706_v41  ;;  %v709_v41 = vadd.s32 64, %v1978_v4 }
 0x10a   : > { %v1987_v11 = vpop.permute.xlu0 %947  ;;  %vm744_vm6 = vcmp.gt.s32.totalorder %v2006_v26, %v2056_v52 }
 0x10c   : > { %v1996_v14 = vpop.permute.xlu1 %834 }
 0x10f   : > { %v590_v23 = vpop.permute.xlu0 %589 }
 0x110   : > { %v653_v28 = vsub.f32 %v590_v23, %v1917_v59  ;;  %v2015_v29 = vpop.permute.xlu1 %844 }
 0x112   : > { %v669_v27 = vmul.f32 %v653_v28, %v653_v28  ;;  %v2073_v28 = vadd.s32 %v1991_v39, %v710_v51  ;;  %v761_v51 = vsel %vm745_vm5, 0.0, %v1593_v43 }
 0x113   : > { %v602_v49 = vpop.permute.xlu0 %601 }
 0x114   : > { %v685_v57 = vadd.f32 %v669_v27, %v1865_v62  ;;  %v656_v48 = vsub.f32 %v602_v49, %v1917_v59  ;;  %v2038_v40 = vpop.permute.xlu1 %854  ;;  %v757_v62 = vsel %vm741_vm2, 0.0, %v1593_v43  ;;  %v716_v27 = vadd.s32 120, %v1978_v4 }
 0x115   : > { %v713_v49 = vadd.s32 96, %v1978_v4  ;;  %vm748_vm8 = vcmp.gt.s32.totalorder %v2006_v26, %v2073_v28 }
 0x116   : > { %v772_v3 = vadd.f32 %v756_v45, %v685_v57  ;;  %v672_v50 = vmul.f32 %v656_v48, %v656_v48  ;;  %v771_v57 = vadd.f32 %v755_v63, %v1932_v34  ;;  %v2084_v48 = vadd.s32 %v1991_v39, %v714_v10 }
 0x117   : > { %v610_v61 = vpop.permute.xlu0 %609  ;;  %v2108_v10 = vadd.s32 %v1991_v39, %v709_v41  ;;  %v760_v41 = vsel %vm744_vm6, 0.0, %v1593_v43 }
 0x118   : > { %1517 = vrsqrt.f32 %v772_v3  ;;  %v688_v44 = vadd.f32 %v672_v50, %v1877_v8  ;;  %v658_v19 = vsub.f32 %v610_v61, %v1917_v59  ;;  %v2070_v23 = vpop.permute.xlu1 %864  ;;  %v711_v8 = vadd.s32 80, %v1978_v4  ;;  %2494 = vst [vmem:[#allocation6_spill] sm:$0xff] %v2084_v48 }
 0x119   : > { %v715_v3 = vadd.s32 112, %v1978_v4  ;;  %v758_v50 = vsel %vm742_vm4, 0.0, %v1593_v43  ;;  %v2105_v4 = vadd.s32 %v1991_v39, %v716_v27  ;;  %v2116_v61 = vadd.s32 %v1991_v39, %v713_v49 }
 0x11a   : > { %v775_v33 = vadd.f32 %v759_v12, %v688_v44  ;;  %v674_v45 = vmul.f32 %v658_v19, %v658_v19  ;;  %v773_v44 = vadd.f32 %v757_v62, %v1938_v37  ;;  %vm752_vm10 = vcmp.gt.s32.totalorder %v2006_v26, %v2084_v48  ;;  %v2143_v62 = vld [vmem:[%s1680_s15 + $0x1] ss:$0 sm:$0xff] }
 0x11b   : > { %v618_v2 = vpop.permute.xlu0 %617  ;;  %2495 = vst [vmem:[#allocation7_spill] sm:$0xff] %v2105_v4  ;;  %2497 = vst [vmem:[#allocation9_spill] sm:$0xff] %v2116_v61  ;;  %v2122_v27 = vadd.s32 %v1991_v39, %v715_v3  ;;  %v764_v37 = vsel %vm748_vm8, 0.0, %v1593_v43  ;;  %vm754_vm11 = vcmp.gt.s32.totalorder %v2006_v26, %v2105_v4  ;;  %vm747_vm12 = vcmp.gt.s32.totalorder %v2006_v26, %v2108_v10 }
 0x11c   : > { %1519 = vrsqrt.f32 %v775_v33  ;;  %v690_v34 = vadd.f32 %v674_v45, %v1885_v15  ;;  %v2098_v63 = vpop.permute.xlu1 %874  ;;  %v2113_v15 = vadd.s32 %v1991_v39, %v711_v8  ;;  %v762_v33 = vsel %vm746_vm7, 0.0, %v1593_v43 }
 0x11d   : > { %1521 = vrsqrt.f32 %v771_v57  ;;  %2498 = vst [vmem:[#allocation10_spill] sm:$0xff] %v2122_v27  ;;  %v766_v39 = vsel %vm750_vm9, 0.0, %v1593_v43  ;;  %v774_v8 = vadd.f32 %v758_v50, %v1945_v25  ;;  %v768_v49 = vsel %vm752_vm10, 0.0, %v1593_v43 }
 0x11e   : > { %v777_v12 = vadd.f32 %v761_v51, %v690_v34  ;;  %2496 = vst [vmem:[#allocation8_spill] sm:$0xff] %v2113_v15  ;;  %vm749_vm13 = vcmp.gt.s32.totalorder %v2006_v26, %v2113_v15  ;;  %vm751_vm14 = vcmp.gt.s32.totalorder %v2006_v26, %v2116_v61  ;;  %v776_v57 = vadd.f32 %v760_v41, %v1952_v35 }
 0x11f   : > { %v626_v19 = vpop.permute.xlu0 %625  ;;  %v660_v51 = vsub.f32 %v618_v2, %v1917_v59  ;;  %vm753_vm15 = vcmp.gt.s32.totalorder %v2006_v26, %v2122_v27  ;;  %v778_v25 = vadd.f32 %v762_v33, %v1958_v16  ;;  %v991_v50 = vadd.f32 %v2143_v62, %v1973_v36 }
 0x120   : > { %1523 = vrsqrt.f32 %v777_v12  ;;  %v2132_v45 = vpop.permute.xlu1 %884  ;;  %v2169_v34 = vsel %vm754_vm11, 0.0, %v1593_v43  ;;  %v763_v35 = vsel %vm747_vm12, 0.0, %v1593_v43  ;;  %v780_v16 = vadd.f32 %v764_v37, %v1964_v30 }
 0x121   : > { %2499 = vst [vmem:[#allocation11_spill] sm:$0xff] %v2132_v45  ;;  %1525 = vrsqrt.f32 %v773_v44  ;;  %v2180_v44 = vld [vmem:[%s1680_s15] ss:$0 sm:$0xff]  ;;  %v765_v36 = vsel %vm749_vm13, 0.0, %v1593_v43  ;;  %v662_v41 = vsub.f32 %v626_v19, %v1917_v59  ;;  %v2192_v33 = vsel %vm751_vm14, 0.0, %v1593_v43 }
 0x122   : > { %1527 = vrsqrt.f32 %v774_v8  ;;  %v782_v4 = vadd.f32 %v766_v39, %v1970_v56  ;;  %v2200_v30 = vsel %vm753_vm15, 0.0, %v1593_v43  ;;  %v784_v19 = vadd.f32 %v768_v49, %v1975_v53 }
 0x123   : > { %v634_v3 = vpop.permute.xlu0 %633  ;;  %1529 = vrsqrt.f32 %v776_v57  ;;  %v676_v37 = vmul.f32 %v660_v51, %v660_v51  ;;  %v2206_v8 = vmul.f32 %v2180_v44, %v1858_v55  ;;  %v994_v56 = vadd.f32 %v2143_v62, %v1980_v5 }
 0x124   : > { %v2175_v2 = vpop.permute.xlu1 %894  ;;  %v664_v48 = vsub.f32 %v634_v3, %v1917_v59  ;;  %1531 = vrsqrt.f32 %v778_v25  ;;  %v2214_v43 = vmul.f32 %v2180_v44, %v1863_v60  ;;  %v2218_v53 = vmul.f32 %v2180_v44, %v1870_v0 }
 0x125   : > { %2500 = vst [vmem:[#allocation12_spill] sm:$0xff] %v2175_v2  ;;  %v2177_v12 = vpop.eup %1517  ;;  %1533 = vrsqrt.f32 %v780_v16  ;;  %v678_v49 = vmul.f32 %v662_v41, %v662_v41  ;;  %v2222_v55 = vmul.f32 %v2180_v44, %v1875_v6  ;;  %v692_v51 = vadd.f32 %v676_v37, %v1893_v22 }
 0x126   : > { %v1007_v47 = vmul.f32 %v2177_v12, %v991_v50  ;;  %1535 = vrsqrt.f32 %v782_v4  ;;  %v680_v60 = vmul.f32 %v664_v48, %v664_v48  ;;  %v907_v16 = vmul.f32 %v2180_v44, %v1984_v7 }
 0x127   : > { %v642_v2 = vpop.permute.xlu0 %641  ;;  %1537 = vrsqrt.f32 %v784_v19  ;;  %v996_v6 = vadd.f32 %v2143_v62, %v1987_v11  ;;  %v2239_v22 = vmul.f32 %v2180_v44, %v1996_v14  ;;  %v910_v48 = vmul.f32 %v2180_v44, %v2015_v29 }
 0x128   : > { %v1023_v39 = vmul.f32 %v1007_v47, %v1007_v47  ;;  %v694_v19 = vadd.f32 %v678_v49, %v1901_v32  ;;  %v666_v49 = vsub.f32 %v642_v2, %v1917_v59 }
 0x129   : > { %v2210_v50 = vpop.eup %1519  ;;  %v924_v57 = vpop.permute.xlu1 %923 }
 0x12a   : > { %v1039_v5 = vmul.f32 %v1023_v39, %v1023_v39  ;;  %v1010_v47 = vmul.f32 %v2210_v50, %v994_v56  ;;  %v990_v3 = vadd.f32 %v2143_v62, %v924_v57  ;;  %v2229_v0 = vpop.eup %1521 }
 0x12b   : > { %v2227_v25 = vpop.permute.xlu0 %1135 }
 0x12c   : > { %v1055_v4 = vmul.f32 %v1039_v5, %v1023_v39  ;;  %v1026_v41 = vmul.f32 %v1010_v47, %v1010_v47  ;;  %v1006_v37 = vmul.f32 %v2229_v0, %v990_v3  ;;  %v779_v39 = vadd.f32 %v763_v35, %v692_v51 }
 0x12d   : > { %v2235_v27 = vpop.eup %1523  ;;  %v932_v56 = vpop.permute.xlu1 %931  ;;  %v696_v5 = vadd.f32 %v680_v60, %v1910_v54  ;;  %v912_v3 = vmul.f32 %v2180_v44, %v2038_v40 }
 0x12e   : > { %v1071_v7 = vmul.f32 %v1055_v4, %v1055_v4  ;;  %v1087_v57 = vmul.f32 2.0, %v1055_v4  ;;  %v1042_v61 = vmul.f32 %v1026_v41, %v1026_v41  ;;  %v1012_v11 = vmul.f32 %v2235_v27, %v996_v6  ;;  %v2248_v46 = vpop.eup %1525 }
 0x12f   : > { %v1022_v47 = vmul.f32 %v1006_v37, %v1006_v37  ;;  %v992_v14 = vadd.f32 %v2143_v62, %v932_v56  ;;  %v1144_v24 = vpop.permute.xlu0 %1143  ;;  %v781_v4 = vadd.f32 %v765_v36, %v694_v19  ;;  %v1528_v56 = vpop.eup %1527  ;;  %1539 = vrsqrt.f32 %v779_v39 }
 0x130   : > { %v1103_v29 = vsub.f32 %v1071_v7, %v1087_v57  ;;  %v1058_v45 = vmul.f32 %v1042_v61, %v1026_v41  ;;  %v1028_v32 = vmul.f32 %v1012_v11, %v1012_v11  ;;  %v783_v7 = vadd.f32 %v2192_v33, %v696_v5  ;;  %v2256_v57 = vpop.eup %1529 }
 0x131   : > { %v1038_v20 = vmul.f32 %v1022_v47, %v1022_v47  ;;  %v1008_v35 = vmul.f32 %v2248_v46, %v992_v14  ;;  %v936_v51 = vpop.permute.xlu1 %935  ;;  %v682_v19 = vmul.f32 %v666_v49, %v666_v49  ;;  %v2258_v11 = vpop.eup %1531  ;;  %1541 = vrsqrt.f32 %v781_v4  ;;  %v2261_v14 = vld [vmem:[%s1680_s15 + $0x2] ss:$0 sm:$0xff] }
 0x132   : > { %v1119_v54 = vmul.f32 %v1103_v29, %v907_v16  ;;  %v1074_v60 = vmul.f32 %v1058_v45, %v1058_v45  ;;  %v1090_v6 = vmul.f32 2.0, %v1058_v45  ;;  %v1044_v37 = vmul.f32 %v1028_v32, %v1028_v32 }
 0x133   : > { %v1054_v61 = vmul.f32 %v1038_v20, %v1022_v47  ;;  %v1024_v41 = vmul.f32 %v1008_v35, %v1008_v35  ;;  %v993_v59 = vadd.f32 %v2143_v62, %v936_v51  ;;  %v1148_v2 = vpop.permute.xlu0 %1147  ;;  %v2263_v20 = vpop.eup %1533  ;;  %1543 = vrsqrt.f32 %v783_v7 }
 0x134   : > { %v1106_v40 = vsub.f32 %v1074_v60, %v1090_v6  ;;  %v1060_v36 = vmul.f32 %v1044_v37, %v1028_v32  ;;  %v2265_v15 = vpop.eup %1535  ;;  %v698_v37 = vadd.f32 %v682_v19, %v1920_v1  ;;  %v1204_v7 = vmul.f32 %v2261_v14, %v1144_v24 }
 0x135   : > { %v1070_v45 = vmul.f32 %v1054_v61, %v1054_v61  ;;  %v1086_v16 = vmul.f32 2.0, %v1054_v61  ;;  %v1040_v29 = vmul.f32 %v1024_v41, %v1024_v41  ;;  %v944_v33 = vpop.permute.xlu1 %943  ;;  %v1009_v51 = vmul.f32 %v1528_v56, %v993_v59  ;;  %v2268_v60 = vpop.eup %1537 }
 0x136   : > { %v1122_v5 = vmul.f32 %v1106_v40, %v910_v48  ;;  %v1076_v47 = vmul.f32 %v1060_v36, %v1060_v36  ;;  %v1092_v35 = vmul.f32 2.0, %v1060_v36  ;;  %v995_v49 = vadd.f32 %v2143_v62, %v944_v33 }
 0x137   : > { %v1102_v39 = vsub.f32 %v1070_v45, %v1086_v16  ;;  %v1056_v32 = vmul.f32 %v1040_v29, %v1024_v41  ;;  %v1152_v4 = vpop.permute.xlu0 %1151  ;;  %v1202_v61 = vmul.f32 %v2261_v14, %v2227_v25  ;;  %v1025_v48 = vmul.f32 %v1009_v51, %v1009_v51 }
 0x138   : > { %v1108_v6 = vsub.f32 %v1076_v47, %v1092_v35  ;;  %v1235_v41 = vsel %vm740_vm0, %v1119_v54, 0.0  ;;  %v1011_v1 = vmul.f32 %v2256_v57, %v995_v49 }
 0x139   : > { %v1118_v40 = vmul.f32 %v1102_v39, %v2206_v8  ;;  %v1072_v59 = vmul.f32 %v1056_v32, %v1056_v32  ;;  %v1088_v36 = vmul.f32 2.0, %v1056_v32  ;;  %v952_v45 = vpop.permute.xlu1 %951  ;;  %v1041_v29 = vmul.f32 %v1025_v48, %v1025_v48 }
 0x13a   : > { %v2278_v16 = vmul.f32 %v1108_v6, %v912_v3  ;;  %v1205_v8 = vmul.f32 %v2261_v14, %v1148_v2  ;;  %v997_v33 = vadd.f32 %v2143_v62, %v952_v45  ;;  %v1218_v35 = vmul.f32 %v2229_v0, %v1202_v61 }
 0x13b   : > { %v1234_v25 = vsel %vm739_vm1, %v1118_v40, 0.0  ;;  %v1104_v19 = vsub.f32 %v1072_v59, %v1088_v36  ;;  %v1156_v24 = vpop.permute.xlu0 %1155  ;;  %v1057_v51 = vmul.f32 %v1041_v29, %v1025_v48  ;;  %v1027_v54 = vmul.f32 %v1011_v1, %v1011_v1 }
 0x13c   : > { %v1250_v47 = vadd.f32 %v1235_v41, %v1234_v25  ;;  %v1220_v39 = vmul.f32 %v2248_v46, %v1204_v7  ;;  %v1206_v32 = vmul.f32 %v2261_v14, %v1152_v4  ;;  %v1013_v49 = vmul.f32 %v2258_v11, %v997_v33  ;;  %v1540_v45 = vpop.eup %1539 }
 0x13d   : > { %v1120_v3 = vmul.f32 %v1104_v19, %v2239_v22  ;;  %v2292_v6 = vadd.f32 %v2200_v30, %v698_v37  ;;  %v1073_v2 = vmul.f32 %v1057_v51, %v1057_v51  ;;  %v1089_v40 = vmul.f32 2.0, %v1057_v51 }
 0x13e   : > { %v1043_v59 = vmul.f32 %v1027_v54, %v1027_v54  ;;  %v1140_v36 = vpop.permute.xlu1 %1139  ;;  %v1221_v61 = vmul.f32 %v1528_v56, %v1205_v8  ;;  %v1029_v48 = vmul.f32 %v1013_v49, %v1013_v49  ;;  %v1265_v4 = vsel %vm739_vm1, %v1218_v35, 0.0  ;;  %v2306_v25 = vpop.eup %1541 }
 0x13f   : > { %v1236_v0 = vsel %vm741_vm2, %v1120_v3, 0.0  ;;  %v1203_v22 = vmul.f32 %v2261_v14, %v1140_v36  ;;  %v1160_v46 = vpop.permute.xlu0 %1159  ;;  %v1105_v30 = vsub.f32 %v1073_v2, %v1089_v40  ;;  %v1267_v41 = vsel %vm741_vm2, %v1220_v39, 0.0 }
 0x140   : > { %v1251_v7 = vadd.f32 %v1250_v47, %v1236_v0  ;;  %v1059_v37 = vmul.f32 %v1043_v59, %v1027_v54  ;;  %v1222_v29 = vmul.f32 %v2210_v50, %v1206_v32  ;;  %v1045_v1 = vmul.f32 %v1029_v48, %v1029_v48 }
 0x141   : > { %v1219_v56 = vmul.f32 %v2177_v12, %v1203_v22  ;;  %v1121_v19 = vmul.f32 %v1105_v30, %v2214_v43  ;;  %v1207_v33 = vmul.f32 %v2261_v14, %v1156_v24  ;;  %v1238_v47 = vsel %vm743_vm3, %v1122_v5, 0.0  ;;  %v2319_v43 = vpop.eup %1543 }
 0x142   : > { %v1075_v8 = vmul.f32 %v1059_v37, %v1059_v37  ;;  %v1091_v18 = vmul.f32 2.0, %v1059_v37  ;;  %v1268_v21 = vsel %vm742_vm4, %v1221_v61, 0.0  ;;  %v1061_v50 = vmul.f32 %v1045_v1, %v1029_v48 }
 0x143   : > { %v1266_v12 = vsel %vm740_vm0, %v1219_v56, 0.0  ;;  %v956_v35 = vpop.permute.xlu1 %955  ;;  %v1164_v51 = vpop.permute.xlu0 %1163  ;;  %v1237_v24 = vsel %vm742_vm4, %v1121_v19, 0.0  ;;  %v1208_v5 = vmul.f32 %v2261_v14, %v1160_v46  ;;  %v1269_v40 = vsel %vm743_vm3, %v1222_v29, 0.0 }
 0x144   : > { %v1107_v54 = vsub.f32 %v1075_v8, %v1091_v18  ;;  %v1281_v3 = vadd.f32 %v1266_v12, %v1265_v4  ;;  %v1252_v39 = vadd.f32 %v1251_v7, %v1237_v24  ;;  %v1077_v32 = vmul.f32 %v1061_v50, %v1061_v50 }
 0x145   : > { %v1093_v49 = vmul.f32 2.0, %v1061_v50  ;;  %v998_v2 = vadd.f32 %v2143_v62, %v956_v35  ;;  %v1223_v59 = vmul.f32 %v2256_v57, %v1207_v33  ;;  %v1209_v48 = vmul.f32 %v2261_v14, %v1164_v51 }
 0x146   : > { %v1123_v17 = vmul.f32 %v1107_v54, %v2218_v53  ;;  %v1282_v36 = vadd.f32 %v1281_v3, %v1267_v41  ;;  %v1253_v38 = vadd.f32 %v1252_v39, %v1238_v47  ;;  %v1224_v53 = vmul.f32 %v2235_v27, %v1208_v5 }
 0x147   : > { %v1109_v0 = vsub.f32 %v1077_v32, %v1093_v49  ;;  %v1014_v61 = vmul.f32 %v1540_v45, %v998_v2  ;;  %v960_v22 = vpop.permute.xlu1 %959  ;;  %v1168_v46 = vpop.permute.xlu0 %1167  ;;  %v1240_v29 = vsel %vm745_vm5, %v2278_v16, 0.0  ;;  %v1270_v1 = vsel %vm744_vm6, %v1223_v59, 0.0 }
 0x148   : > { %v1239_v4 = vsel %vm744_vm6, %v1123_v17, 0.0  ;;  %v1283_v7 = vadd.f32 %v1282_v36, %v1268_v21  ;;  %v999_v31 = vadd.f32 %v2143_v62, %v960_v22  ;;  %v1210_v41 = vmul.f32 %v2261_v14, %v1168_v46 }
 0x149   : > { %v1254_v30 = vadd.f32 %v1253_v38, %v1239_v4  ;;  %v1125_v57 = vmul.f32 %v1109_v0, %v2222_v55  ;;  %v1030_v37 = vmul.f32 %v1014_v61, %v1014_v61  ;;  %v1225_v18 = vmul.f32 %v2258_v11, %v1209_v48 }
 0x14a   : > { %v1284_v56 = vadd.f32 %v1283_v7, %v1269_v40  ;;  %v1015_v27 = vmul.f32 %v2263_v20, %v999_v31  ;;  %v1271_v35 = vsel %vm745_vm5, %v1224_v53, 0.0  ;;  %v1226_v24 = vmul.f32 %v1540_v45, %v1210_v41 }
 0x14b   : > { %v1241_v19 = vsel %vm746_vm7, %v1125_v57, 0.0  ;;  %v1255_v55 = vadd.f32 %v1254_v30, %v1240_v29  ;;  %v1046_v8 = vmul.f32 %v1030_v37, %v1030_v37  ;;  %v964_v33 = vpop.permute.xlu1 %963  ;;  %v1172_v47 = vpop.permute.xlu0 %1171  ;;  %v786_v54 = vadd.f32 %v2169_v34, %v1982_v42 }
 0x14c   : > { %v1285_v21 = vadd.f32 %v1284_v56, %v1270_v1  ;;  %v1031_v50 = vmul.f32 %v1015_v27, %v1015_v27  ;;  %v1000_v16 = vadd.f32 %v2143_v62, %v964_v33  ;;  %v1211_v52 = vmul.f32 %v2261_v14, %v1172_v47 }
 0x14d   : > { %v1256_v12 = vadd.f32 %v1255_v55, %v1241_v19  ;;  %v1062_v51 = vmul.f32 %v1046_v8, %v1030_v37  ;;  %v1272_v49 = vsel %vm746_vm7, %v1225_v18, 0.0  ;;  %1545 = vrsqrt.f32 %v2292_v6 }
 0x14e   : > { %v1286_v3 = vadd.f32 %v1285_v21, %v1271_v35  ;;  %v1047_v11 = vmul.f32 %v1031_v50, %v1031_v50  ;;  %v1016_v5 = vmul.f32 %v2306_v25, %v1000_v16  ;;  %v1227_v2 = vmul.f32 %v2263_v20, %v1211_v52  ;;  %v2509_v35 = vld [vmem:[#allocation4_spill] sm:$0xff] }
 0x14f   : > { %v1078_v39 = vmul.f32 %v1062_v51, %v1062_v51  ;;  %v1094_v32 = vmul.f32 2.0, %v1062_v51  ;;  %v968_v17 = vpop.permute.xlu1 %967  ;;  %v914_v42 = vmul.f32 %v2180_v44, %v2070_v23  ;;  %v1273_v59 = vsel %vm747_vm12, %v1226_v24, 0.0  ;;  %v1180_v51 = vpop.permute.xlu0 %1179 }
 0x150   : > { %v1287_v58 = vadd.f32 %v1286_v3, %v1272_v49  ;;  %v1063_v45 = vmul.f32 %v1047_v11, %v1031_v50  ;;  %v1032_v40 = vmul.f32 %v1016_v5, %v1016_v5  ;;  %v1001_v36 = vadd.f32 %v2143_v62, %v968_v17  ;;  %v2502_v3 = vld [vmem:[#allocation2_spill] sm:$0xff] }
 0x151   : > { %v1110_v34 = vsub.f32 %v1078_v39, %v1094_v32  ;;  %v915_v6 = vmul.f32 %v2180_v44, %v1883_v13  ;;  %v1274_v48 = vsel %vm748_vm8, %v1227_v2, 0.0  ;;  %1547 = vrsqrt.f32 %v786_v54 }
 0x152   : > { %v1079_v9 = vmul.f32 %v1063_v45, %v1063_v45  ;;  %v1095_v38 = vmul.f32 2.0, %v1063_v45  ;;  %v1288_v0 = vadd.f32 %v1287_v58, %v1273_v59  ;;  %v1048_v20 = vmul.f32 %v1032_v40, %v1032_v40 }
 0x153   : > { %v1126_v61 = vmul.f32 %v1110_v34, %v914_v42  ;;  %v1017_v23 = vmul.f32 %v2265_v15, %v1001_v36  ;;  %v972_v22 = vpop.permute.xlu1 %971  ;;  %v916_v27 = vmul.f32 %v2180_v44, %v2098_v63  ;;  %v917_v11 = vmul.f32 %v2180_v44, %v2502_v3 }
 0x154   : > { %v1111_v46 = vsub.f32 %v1079_v9, %v1095_v38  ;;  %v1064_v4 = vmul.f32 %v1048_v20, %v1032_v40  ;;  %v2376_v7 = vadd.f32 %v1288_v0, %v1274_v48  ;;  %v1002_v53 = vadd.f32 %v2143_v62, %v972_v22  ;;  %v2503_v9 = vld [vmem:[#allocation11_spill] sm:$0xff] }
 0x155   : > { %v1242_v31 = vsel %vm747_vm12, %v1126_v61, 0.0  ;;  %v1033_v13 = vmul.f32 %v1017_v23, %v1017_v23  ;;  %v1213_v42 = vmul.f32 %v2261_v14, %v1180_v51  ;;  %v918_v38 = vmul.f32 %v2180_v44, %v2503_v9  ;;  %v1188_v23 = vpop.permute.xlu0 %1187 }
 0x156   : > { %v1257_v30 = vadd.f32 %v1256_v12, %v1242_v31  ;;  %v1127_v57 = vmul.f32 %v1111_v46, %v915_v6  ;;  %v1080_v37 = vmul.f32 %v1064_v4, %v1064_v4  ;;  %v1096_v41 = vmul.f32 2.0, %v1064_v4 }
 0x157   : > { %v1049_v29 = vmul.f32 %v1033_v13, %v1033_v13  ;;  %v1018_v1 = vmul.f32 %v2319_v43, %v1002_v53  ;;  %v976_v56 = vpop.permute.xlu1 %975 }
 0x158   : > { %v1243_v19 = vsel %vm748_vm8, %v1127_v57, 0.0  ;;  %v1112_v55 = vsub.f32 %v1080_v37, %v1096_v41  ;;  %v1003_v10 = vadd.f32 %v2143_v62, %v976_v56  ;;  %v1215_v56 = vmul.f32 %v2261_v14, %v1188_v23 }
 0x159   : > { %v1258_v8 = vadd.f32 %v1257_v30, %v1243_v19  ;;  %v1065_v18 = vmul.f32 %v1049_v29, %v1033_v13  ;;  %v1034_v33 = vmul.f32 %v1018_v1, %v1018_v1  ;;  %v2505_v13 = vld [vmem:[#allocation3_spill] sm:$0xff] }
 0x15a   : > { %v1128_v47 = vmul.f32 %v1112_v55, %v916_v27  ;;  %v1019_v21 = vmul.f32 %v2268_v60, %v1003_v10  ;;  %v2394_v54 = vpop.eup %1545  ;;  %v919_v30 = vmul.f32 %v2180_v44, %v2505_v13 }
 0x15b   : > { %v1081_v50 = vmul.f32 %v1065_v18, %v1065_v18  ;;  %v1097_v16 = vmul.f32 2.0, %v1065_v18  ;;  %v1050_v52 = vmul.f32 %v1034_v33, %v1034_v33  ;;  %v980_v12 = vpop.permute.xlu1 %979 }
 0x15c   : > { %v1244_v63 = vsel %vm749_vm13, %v1128_v47, 0.0  ;;  %v1035_v28 = vmul.f32 %v1019_v21, %v1019_v21  ;;  %v1004_v24 = vadd.f32 %v2143_v62, %v980_v12 }
 0x15d   : > { %v1259_v5 = vadd.f32 %v1258_v8, %v1244_v63  ;;  %v1113_v39 = vsub.f32 %v1081_v50, %v1097_v16  ;;  %v1066_v32 = vmul.f32 %v1050_v52, %v1034_v33  ;;  %v1196_v52 = vpop.permute.xlu0 %1195 }
 0x15e   : > { %v1051_v49 = vmul.f32 %v1035_v28, %v1035_v28  ;;  %v1020_v2 = vmul.f32 %v2394_v54, %v1004_v24  ;;  %v1548_v61 = vpop.eup %1547 }
 0x15f   : > { %v1129_v17 = vmul.f32 %v1113_v39, %v917_v11  ;;  %v1082_v58 = vmul.f32 %v1066_v32, %v1066_v32  ;;  %v1098_v45 = vmul.f32 2.0, %v1066_v32  ;;  %v984_v40 = vpop.permute.xlu1 %983  ;;  %v1231_v11 = vmul.f32 %v2268_v60, %v1215_v56 }
 0x160   : > { %v1067_v34 = vmul.f32 %v1051_v49, %v1035_v28  ;;  %v1036_v59 = vmul.f32 %v1020_v2, %v1020_v2  ;;  %v1005_v36 = vadd.f32 %v2143_v62, %v984_v40  ;;  %v1229_v62 = vmul.f32 %v2265_v15, %v1213_v42  ;;  %v2507_v15 = vld [vmem:[#allocation12_spill] sm:$0xff] }
 0x161   : > { %v1245_v20 = vsel %vm750_vm9, %v1129_v17, 0.0  ;;  %v1114_v6 = vsub.f32 %v1082_v58, %v1098_v45  ;;  %v920_v21 = vmul.f32 %v2180_v44, %v2507_v15  ;;  %v1217_v32 = vmul.f32 %v2261_v14, %v1196_v52 }
 0x162   : > { %v1260_v48 = vadd.f32 %v1259_v5, %v1245_v20  ;;  %v1083_v22 = vmul.f32 %v1067_v34, %v1067_v34  ;;  %v1099_v46 = vmul.f32 2.0, %v1067_v34  ;;  %v1052_v4 = vmul.f32 %v1036_v59, %v1036_v59 }
 0x163   : > { %v1130_v53 = vmul.f32 %v1114_v6, %v918_v38  ;;  %v1021_v31 = vmul.f32 %v1548_v61, %v1005_v36  ;;  %v921_v58 = vmul.f32 %v2180_v44, %v2509_v35  ;;  %v1278_v44 = vsel %vm752_vm10, %v1231_v11, 0.0  ;;  %v1296_v6 = vld [vmem:[%s1686_s29] sm:$0xff] }
 0x164   : > { %v1115_v57 = vsub.f32 %v1083_v22, %v1099_v46  ;;  %v1068_v37 = vmul.f32 %v1052_v4, %v1036_v59  ;;  %v1176_v41 = vpop.permute.xlu1 %1175  ;;  %v1233_v9 = vmul.f32 %v1548_v61, %v1217_v32  ;;  %v1299_v61 = vld [vmem:[%s1691_s8] sm:$0xff] }
 0x165   : > { %v1246_v1 = vsel %vm751_vm14, %v1130_v53, 0.0  ;;  %v1037_v27 = vmul.f32 %v1021_v31, %v1021_v31  ;;  %v1212_v19 = vmul.f32 %v2261_v14, %v1176_v41 }
 0x166   : > { %v1261_v55 = vadd.f32 %v1260_v48, %v1246_v1  ;;  %v1131_v10 = vmul.f32 %v1115_v57, %v919_v30  ;;  %v1084_v8 = vmul.f32 %v1068_v37, %v1068_v37  ;;  %v1100_v18 = vmul.f32 2.0, %v1068_v37 }
 0x167   : > { %v1053_v33 = vmul.f32 %v1037_v27, %v1037_v27  ;;  %v1228_v47 = vmul.f32 %v2306_v25, %v1212_v19  ;;  %v1276_v25 = vsel %vm750_vm9, %v1229_v62, 0.0  ;;  %v1280_v4 = vsel %vm754_vm11, %v1233_v9, 0.0 }
 0x168   : > { %v1247_v16 = vsel %vm752_vm10, %v1131_v10, 0.0  ;;  %v1116_v12 = vsub.f32 %v1084_v8, %v1100_v18  ;;  %v1184_v63 = vpop.permute.xlu1 %1183 }
 0x169   : > { %v1262_v51 = vadd.f32 %v1261_v55, %v1247_v16  ;;  %v1069_v28 = vmul.f32 %v1053_v33, %v1037_v27  ;;  %v1275_v24 = vsel %vm749_vm13, %v1228_v47, 0.0  ;;  %v1214_v3 = vmul.f32 %v2261_v14, %v1184_v63 }
 0x16a   : > { %v1132_v5 = vmul.f32 %v1116_v12, %v920_v21  ;;  %v1290_v39 = vadd.f32 %v2376_v7, %v1275_v24 }
 0x16b   : > { %v1085_v49 = vmul.f32 %v1069_v28, %v1069_v28  ;;  %v1101_v2 = vmul.f32 2.0, %v1069_v28  ;;  %v1230_v17 = vmul.f32 %v2319_v43, %v1214_v3 }
 0x16c   : > { %v1248_v40 = vsel %vm753_vm15, %v1132_v5, 0.0  ;;  %v1291_v42 = vadd.f32 %v1290_v39, %v1276_v25  ;;  %v1192_v34 = vpop.permute.xlu1 %1191 }
 0x16d   : > { %v1263_v60 = vadd.f32 %v1262_v51, %v1248_v40  ;;  %v1117_v59 = vsub.f32 %v1085_v49, %v1101_v2  ;;  %v1277_v7 = vsel %vm751_vm14, %v1230_v17, 0.0  ;;  %v1216_v36 = vmul.f32 %v2261_v14, %v1192_v34 }
 0x16e   : > { %v1292_v43 = vadd.f32 %v1291_v42, %v1277_v7 }
 0x16f   : > { %v1133_v38 = vmul.f32 %v1117_v59, %v921_v58  ;;  %v1232_v0 = vmul.f32 %v2394_v54, %v1216_v36 }
 0x170   : > { %v1293_v20 = vadd.f32 %v1292_v43, %v1278_v44 }
 0x171   : > { %v1249_v23 = vsel %vm754_vm11, %v1133_v38, 0.0  ;;  %v1279_v14 = vsel %vm753_vm15, %v1232_v0, 0.0 }
 0x172   : > { %v1264_v22 = vadd.f32 %v1263_v60, %v1249_v23  ;;  %v1294_v46 = vadd.f32 %v1293_v20, %v1279_v14 }
 0x174   : > { %v1297_v53 = vadd.f32 %v1296_v6, %v1264_v22  ;;  %v1295_v31 = vadd.f32 %v1294_v46, %v1280_v4 }
 0x176   : > { %1298 = vst [vmem:[%s1686_s29] sm:$0xff] %v1297_v53  ;;  %v1300_v54 = vadd.f32 %v1299_v61, %v1295_v31 }
 0x178   : > { %1301 = vst [vmem:[%s1691_s8] sm:$0xff] %v1300_v54 }
 0x179 PF: > { %s16_s22 = sadd.s32 1, %s1587_s22   ;;  %s2512_s18 = smov %s1579_s20 }
 0x17a   : > { %p13_p10 = scmp.ge.s32.totalorder %s16_s22, 18   ;;  %s2513_s19 = smov %s1583_s21 }
 0x17b   : > { %s2514_s20 = smov %s2517_s23  ;;  %s2515_s21 = smov %s2521_s24 }
 0x17c   :  { %15 = sbr.rel (!%p13_p10) target bundleno = 3 (0x3), region = 95 }

</bundles_post_ra>
